<compile_context>
chip_gen: v7x
topology: tpu7x:2x2x1
jax: 0.10.0
libtpu: 0.0.40
codegen_flags: <defaults>
</compile_context>

<pallas_src>
import functools

import jax
import jax.numpy as jnp
from jax.experimental import pallas as pl
from jax.experimental.pallas import tpu as pltpu

Q_MAX_16 = 2.0**15 - 1
Q_MIN_16 = -(2.0**15)
Q_MAX_8 = 2.0**7 - 1
Q_MIN_8 = -(2.0**7)

LANES = 128  # padded output-channel width -> lane-dense matmuls and stores


def _round_up(x, m):
    return (x + m - 1) // m * m


def _quant(x, scale, qmin, qmax):
    # quant_N(X, s) = Hardtanh(round(X / s), qmin, qmax) * s
    # `scale` is a trace-time Python float (power of two), so 1/scale is an
    # exact constant and the divide becomes a single multiply.
    return jnp.clip(jnp.round(x * (1.0 / scale)), qmin, qmax) * scale


# ---------------------------------------------------------------------------
# Fused ResBlock kernel (one grid step = one image):
#   stage 1: conv1 + downsample from ONE matmul on the stride-2 im2col LHS
#   stage 2: conv2 as ONE big-K matmul on a tap-stacked LHS built in VMEM,
#            fused with the bn-weighted residual, quant_8 and relu epilogue.
# ---------------------------------------------------------------------------
def resblock_kernel(patches_ref, w1d_ref, w2s_ref, b1_ref, bd_ref, b2_ref,
                    bnx_ref, bny_ref, out_ref, o1f_ref, lhs2_ref, *,
                    oh, ow, pad_rows,
                    c_s1, x_s1, c_sd, x_sd, c_s2, x_s2, a_s):
    f32 = jnp.float32
    cp = w2s_ref.shape[-1]
    rows = oh * ow

    # ---- stage 1: conv1 (3x3 s2 p1) and downsample (1x1 s2) in ONE matmul ----
    # patches: (rows, K1) stride-2 im2col (taps stacked on the minor dim).
    # w1d:     (K1, 2*cp) = [conv1 weights | downsample weights at center tap].
    y = jnp.dot(patches_ref[...], w1d_ref[...], preferred_element_type=f32)

    y1 = _quant(y[:, :cp], c_s1, Q_MIN_16, Q_MAX_16) + b1_ref[...]
    y1 = _quant(y1, x_s1, Q_MIN_8, Q_MAX_8)
    y1 = jnp.maximum(y1, 0.0)                          # ResBlock relu(conv1)

    idn = _quant(y[:, cp:], c_sd, Q_MIN_16, Q_MAX_16) + bd_ref[...]
    idn = _quant(idn, x_sd, Q_MIN_8, Q_MAX_8)          # identity stays on-chip

    # conv1 output -> flat, zero-bordered VMEM scratch (zero borders provide
    # conv2's H-direction padding).  Zeroed every step: cheap (tens of KiB)
    # and safe if the "parallel" grid axis is sharded across TensorCores.
    o1f_ref[...] = jnp.zeros_like(o1f_ref)
    o1f_ref[pl.ds(pad_rows, rows), :] = y1.astype(o1f_ref.dtype)

    # ---- build the tap-stacked LHS (rows, 9*cp) for conv2 --------------------
    # Row m of tap (kh,kw) is o1_flat[m + (kh-1)*ow + (kw-1)]: a contiguous
    # static row slice of the padded scratch.  H overflow falls into the zero
    # border; W overflow (row wrap-around) is masked with a column mask.
    col = jax.lax.broadcasted_iota(jnp.int32, (rows, cp), 0) % ow
    not_left = col != 0
    not_right = col != ow - 1
    for kh in range(3):
        for kw in range(3):
            t = kh * 3 + kw
            start = pad_rows + (kh - 1) * ow + (kw - 1)
            slab = o1f_ref[pl.ds(start, rows), :]
            if kw == 0:
                slab = jnp.where(not_left, slab, jnp.zeros_like(slab))
            elif kw == 2:
                slab = jnp.where(not_right, slab, jnp.zeros_like(slab))
            lhs2_ref[:, t * cp:(t + 1) * cp] = slab

    # ---- stage 2: conv2 (3x3 s1 p1) as ONE (rows, 9*cp) x (9*cp, cp) matmul --
    acc = jnp.dot(lhs2_ref[...], w2s_ref[...], preferred_element_type=f32)
    y2 = _quant(acc, c_s2, Q_MIN_16, Q_MAX_16) + b2_ref[...]
    y2 = _quant(y2, x_s2, Q_MIN_8, Q_MAX_8)            # conv2 output (no relu)

    res = y2 * bnx_ref[...] + idn * bny_ref[...]
    res = _quant(res, a_s, Q_MIN_8, Q_MAX_8)
    out_ref[...] = jnp.maximum(res, 0.0).astype(out_ref.dtype)


# ---------------------------------------------------------------------------
# Host-side wrapper (layout plumbing only, done once at the boundaries)
# ---------------------------------------------------------------------------
def _pad_channels_row(v, width):
    v = v.reshape(1, -1).astype(jnp.float32)
    return jnp.pad(v, ((0, 0), (0, width - v.shape[1])))


def resblock_forward(x_nchw, params, scales):
    n, cin, h, w = x_nchw.shape
    cout = params["w1"].shape[0]
    assert h % 2 == 0 and w % 2 == 0
    oh, ow = h // 2, w // 2
    rows = oh * ow
    cp = LANES
    k1 = 9 * cin
    k1p = _round_up(k1, LANES)            # lane-dense im2col minor dim
    pad_rows = _round_up(ow + 1, 16)      # conv2 halo rows (>= ow+1), aligned

    # --- input: NHWC bf16, stride-2 im2col with the 9 taps on the minor dim ---
    x = jnp.transpose(x_nchw, (0, 2, 3, 1)).astype(jnp.bfloat16)
    xpad = jnp.pad(x, ((0, 0), (1, 1), (1, 1), (0, 0)))          # (N,H+2,W+2,C)
    taps = [xpad[:, kh:kh + 2 * oh:2, kw:kw + 2 * ow:2, :].reshape(n, rows, cin)
            for kh in range(3) for kw in range(3)]
    patches = jnp.concatenate(taps, axis=-1)                     # (N, rows, 9*cin)
    patches = jnp.pad(patches, ((0, 0), (0, 0), (0, k1p - k1)))  # (N, rows, k1p)

    # --- weights: conv1 taps stacked along K; downsample folded in as extra N --
    w1s = jnp.transpose(params["w1"], (2, 3, 1, 0)).reshape(k1, cout)
    w1s = jnp.pad(w1s, ((0, k1p - k1), (0, cp - cout)))          # (k1p, cp)
    wd_t = params["wd"][:, :, 0, 0].T                            # (cin, cout)
    wdf = jnp.zeros((k1p, cp), jnp.float32)
    wdf = wdf.at[4 * cin:5 * cin, :cout].set(wd_t)               # center tap only
    w1d = jnp.concatenate([w1s, wdf], axis=1).astype(jnp.bfloat16)   # (k1p, 2cp)

    w2s = jnp.transpose(params["w2"], (2, 3, 1, 0))              # (3,3,cin2,cout)
    w2s = jnp.pad(w2s, ((0, 0), (0, 0), (0, cp - cout), (0, cp - cout)))
    w2s = w2s.reshape(9 * cp, cp).astype(jnp.bfloat16)           # (9*cp, cp)

    b1 = _pad_channels_row(params["b1"], cp)
    bd = _pad_channels_row(params["bd"], cp)
    b2 = _pad_channels_row(params["b2"], cp)
    bnx = _pad_channels_row(params["bn_x"], cp)
    bny = _pad_channels_row(params["bn_y"], cp)

    kernel = functools.partial(
        resblock_kernel, oh=oh, ow=ow, pad_rows=pad_rows,
        c_s1=scales["c_s1"], x_s1=scales["x_s1"],
        c_sd=scales["c_sd"], x_sd=scales["x_sd"],
        c_s2=scales["c_s2"], x_s2=scales["x_s2"], a_s=scales["a_s"])

    # VMEM budget derived from the actual blocks (double-buffered) + scratch.
    in_bytes = (rows * k1p + k1p * 2 * cp + 9 * cp * cp) * 2 + 5 * cp * 4
    out_bytes = rows * cp * 2
    scratch_bytes = ((rows + 2 * pad_rows) * cp + rows * 9 * cp) * 2
    vmem_limit = min(2 * (in_bytes + out_bytes) + scratch_bytes + (16 << 20),
                     48 << 20)   # 48 MiB cap keeps headroom on v7x (64 MiB VMEM)

    out_rows = pl.pallas_call(
        kernel,
        grid=(n,),
        out_shape=jax.ShapeDtypeStruct((n, rows, cp), jnp.bfloat16),
        in_specs=[
            pl.BlockSpec((None, rows, k1p), lambda i: (i, 0, 0)),
            pl.BlockSpec((k1p, 2 * cp), lambda i: (0, 0)),   # resident weights
            pl.BlockSpec((9 * cp, cp), lambda i: (0, 0)),
            pl.BlockSpec((1, cp), lambda i: (0, 0)),
            pl.BlockSpec((1, cp), lambda i: (0, 0)),
            pl.BlockSpec((1, cp), lambda i: (0, 0)),
            pl.BlockSpec((1, cp), lambda i: (0, 0)),
            pl.BlockSpec((1, cp), lambda i: (0, 0)),
        ],
        out_specs=pl.BlockSpec((None, rows, cp), lambda i: (i, 0, 0)),
        scratch_shapes=[
            pltpu.VMEM((rows + 2 * pad_rows, cp), jnp.bfloat16),  # conv1 + halo
            pltpu.VMEM((rows, 9 * cp), jnp.bfloat16),             # conv2 LHS
        ],
        compiler_params=pltpu.CompilerParams(
            dimension_semantics=("parallel",),
            vmem_limit_bytes=vmem_limit),
    )(patches, w1d, w2s, b1, bd, b2, bnx, bny)

    # drop padded lanes; back to NCHW only at the module boundary (bf16 values
    # are exact quant_8 outputs, so the f32 cast is exact).
    out = out_rows.reshape(n, oh, ow, cp)[..., :cout].astype(jnp.float32)
    return jnp.transpose(out, (0, 3, 1, 2))


# ---------------------------------------------------------------------------
# Pure-JAX reference (same bf16 operands / f32 accumulation as the kernel)
# ---------------------------------------------------------------------------
def _conv_ref(x_bf16, w_bf16, b, stride, pad, c_s, x_s):
    y = jax.lax.conv_general_dilated(
        x_bf16, w_bf16, (stride, stride), [(pad, pad), (pad, pad)],
        dimension_numbers=("NCHW", "OIHW", "NCHW"),
        preferred_element_type=jnp.float32)
    y = _quant(y, c_s, Q_MIN_16, Q_MAX_16) + b.reshape(1, -1, 1, 1)
    return _quant(y, x_s, Q_MIN_8, Q_MAX_8)


def _resblock_ref(x, p, s):
    xb = x.astype(jnp.bfloat16)
    out = _conv_ref(xb, p["w1"].astype(jnp.bfloat16), p["b1"], 2, 1,
                    s["c_s1"], s["x_s1"])
    identity = _conv_ref(xb, p["wd"].astype(jnp.bfloat16), p["bd"], 2, 0,
                         s["c_sd"], s["x_sd"])
    out = jnp.maximum(out, 0.0)
    out = _conv_ref(out.astype(jnp.bfloat16), p["w2"].astype(jnp.bfloat16),
                    p["b2"], 1, 1, s["c_s2"], s["x_s2"])
    out = (out * p["bn_x"].reshape(1, -1, 1, 1)
           + identity * p["bn_y"].reshape(1, -1, 1, 1))
    out = _quant(out, s["a_s"], Q_MIN_8, Q_MAX_8)
    return jnp.maximum(out, 0.0)


# ---------------------------------------------------------------------------
if __name__ == "__main__":
    N, INPLANES, PLANES, H, W = 2, 4, 8, 16, 16

    key = jax.random.PRNGKey(0)
    ks = jax.random.split(key, 9)
    x = jax.random.normal(ks[0], (N, INPLANES, H, W), jnp.float32)

    params = {
        "w1": 0.1 * jax.random.normal(ks[1], (PLANES, INPLANES, 3, 3), jnp.float32),
        "b1": 0.1 * jax.random.normal(ks[2], (PLANES,), jnp.float32),
        "wd": 0.1 * jax.random.normal(ks[3], (PLANES, INPLANES, 1, 1), jnp.float32),
        "bd": 0.1 * jax.random.normal(ks[4], (PLANES,), jnp.float32),
        "w2": 0.1 * jax.random.normal(ks[5], (PLANES, PLANES, 3, 3), jnp.float32),
        "b2": 0.1 * jax.random.normal(ks[6], (PLANES,), jnp.float32),
        # bn_x / bn_y: per-channel scales drawn from bn_bag_quant in the original
        "bn_x": 0.5 + jax.random.uniform(ks[7], (PLANES,), jnp.float32),
        "bn_y": 0.5 + jax.random.uniform(ks[8], (PLANES,), jnp.float32),
    }
    # power-of-two quant scales (as the SAVE_FM pass would produce)
    scales = {
        "c_s1": 2.0**-10, "x_s1": 2.0**-4,
        "c_sd": 2.0**-10, "x_sd": 2.0**-4,
        "c_s2": 2.0**-10, "x_s2": 2.0**-4,
        "a_s": 2.0**-4,
    }
    # TODO(synk): SAVE_FM statistics collection (host-side .item() calibration) not translated.

    fwd = jax.jit(functools.partial(resblock_forward, scales=scales))
    out = jax.block_until_ready(fwd(x, params))
    ref = jax.block_until_ready(_resblock_ref(x, params, scales))

    assert out.shape == (N, PLANES, H // 2, W // 2), out.shape
    assert bool(jnp.all(jnp.isfinite(out)))
    diff = jnp.abs(out - ref)
    max_err = float(jnp.max(diff))
    frac_off = float(jnp.mean((diff > 1e-3).astype(jnp.float32)))
    # Kernel and reference use identical bf16 operands with f32 accumulation; the
    # only differences come from rare round() boundary flips due to a different
    # f32 accumulation order, which move a handful of outputs by at most a few
    # output quantization steps.
    assert max_err <= 4.0 * scales["a_s"] + 1e-3, f"max_err={max_err}"
    assert frac_off <= 0.02, f"fraction of quant-boundary flips too high: {frac_off}"
    print("KERNEL_OK")
</pallas_src>

<mosaic_0001>
module attributes {stable_mosaic.version = 11 : i64} {
  func.func @resblock_kernel(%arg0: i32, %arg1: memref<1x64x128xbf16, #tpu.memory_space<vmem>>, %arg2: memref<128x256xbf16, #tpu.memory_space<vmem>>, %arg3: memref<1152x128xbf16, #tpu.memory_space<vmem>>, %arg4: memref<1x128xf32, #tpu.memory_space<vmem>>, %arg5: memref<1x128xf32, #tpu.memory_space<vmem>>, %arg6: memref<1x128xf32, #tpu.memory_space<vmem>>, %arg7: memref<1x128xf32, #tpu.memory_space<vmem>>, %arg8: memref<1x128xf32, #tpu.memory_space<vmem>>, %arg9: memref<1x64x128xbf16, #tpu.memory_space<vmem>>, %arg10: memref<96x128xbf16, #tpu.memory_space<vmem>>, %arg11: memref<64x1152xbf16, #tpu.memory_space<vmem>>) attributes {dimension_semantics = [#tpu.dimension_semantics<parallel>], iteration_bounds = array<i64: 2>, scalar_prefetch = 0 : i64, scratch_operands = 2 : i64, tpu.core_type = #tpu.core_type<tc>, window_params = [{transform_indices = @transform_0, window_bounds = array<i64: 1, 64, 128>}, {pipeline_mode = #tpu.pipeline_mode<synchronous>, transform_indices = @transform_1, window_bounds = array<i64: 128, 256>}, {pipeline_mode = #tpu.pipeline_mode<synchronous>, transform_indices = @transform_2, window_bounds = array<i64: 1152, 128>}, {pipeline_mode = #tpu.pipeline_mode<synchronous>, transform_indices = @transform_3, window_bounds = array<i64: 1, 128>}, {pipeline_mode = #tpu.pipeline_mode<synchronous>, transform_indices = @transform_4, window_bounds = array<i64: 1, 128>}, {pipeline_mode = #tpu.pipeline_mode<synchronous>, transform_indices = @transform_5, window_bounds = array<i64: 1, 128>}, {pipeline_mode = #tpu.pipeline_mode<synchronous>, transform_indices = @transform_6, window_bounds = array<i64: 1, 128>}, {pipeline_mode = #tpu.pipeline_mode<synchronous>, transform_indices = @transform_7, window_bounds = array<i64: 1, 128>}, {transform_indices = @transform_8, window_bounds = array<i64: 1, 64, 128>}]} {
    %c0 = arith.constant 0 : index
    %c0_0 = arith.constant 0 : index
    %c0_1 = arith.constant 0 : index
    %0 = vector.load %arg1[%c0, %c0_0, %c0_1] : memref<1x64x128xbf16, #tpu.memory_space<vmem>>, vector<1x64x128xbf16>
    %1 = vector.shape_cast %0 : vector<1x64x128xbf16> to vector<64x128xbf16>
    %c0_2 = arith.constant 0 : index
    %c0_3 = arith.constant 0 : index
    %2 = vector.load %arg2[%c0_2, %c0_3] : memref<128x256xbf16, #tpu.memory_space<vmem>>, vector<128x256xbf16>
    %cst = arith.constant dense<0.000000e+00> : vector<64x256xf32>
    %3 = tpu.matmul %1, %2, %cst {dimension_numbers = #tpu.dot_dimension_numbers<[1], [0], [0], [1], [0, 0, 1, 1], [], []>} : vector<64x128xbf16>, vector<128x256xbf16>, vector<64x256xf32> -> vector<64x256xf32>
    %4 = vector.extract_strided_slice %3 {offsets = [0, 0], sizes = [64, 128], strides = [1, 1]} : vector<64x256xf32> to vector<64x128xf32>
    %cst_4 = arith.constant 1.024000e+03 : f32
    %5 = vector.broadcast %cst_4 : f32 to vector<64x128xf32>
    %6 = arith.mulf %4, %5 : vector<64x128xf32>
    %7 = math.roundeven %6 : vector<64x128xf32>
    %cst_5 = arith.constant -3.276800e+04 : f32
    %cst_6 = arith.constant 3.276700e+04 : f32
    %8 = vector.broadcast %cst_5 : f32 to vector<64x128xf32>
    %9 = arith.maximumf %8, %7 : vector<64x128xf32>
    %10 = vector.broadcast %cst_6 : f32 to vector<64x128xf32>
    %11 = arith.minimumf %10, %9 : vector<64x128xf32>
    %cst_7 = arith.constant 9.765625E-4 : f32
    %12 = vector.broadcast %cst_7 : f32 to vector<64x128xf32>
    %13 = arith.mulf %11, %12 : vector<64x128xf32>
    %c0_8 = arith.constant 0 : index
    %c0_9 = arith.constant 0 : index
    %14 = vector.load %arg4[%c0_8, %c0_9] : memref<1x128xf32, #tpu.memory_space<vmem>>, vector<1x128xf32>
    %15 = vector.broadcast %14 : vector<1x128xf32> to vector<64x128xf32>
    %16 = arith.addf %13, %15 : vector<64x128xf32>
    %cst_10 = arith.constant 1.600000e+01 : f32
    %17 = vector.broadcast %cst_10 : f32 to vector<64x128xf32>
    %18 = arith.mulf %16, %17 : vector<64x128xf32>
    %19 = math.roundeven %18 : vector<64x128xf32>
    %cst_11 = arith.constant -1.280000e+02 : f32
    %cst_12 = arith.constant 1.270000e+02 : f32
    %20 = vector.broadcast %cst_11 : f32 to vector<64x128xf32>
    %21 = arith.maximumf %20, %19 : vector<64x128xf32>
    %22 = vector.broadcast %cst_12 : f32 to vector<64x128xf32>
    %23 = arith.minimumf %22, %21 : vector<64x128xf32>
    %cst_13 = arith.constant 6.250000e-02 : f32
    %24 = vector.broadcast %cst_13 : f32 to vector<64x128xf32>
    %25 = arith.mulf %23, %24 : vector<64x128xf32>
    %cst_14 = arith.constant 0.000000e+00 : f32
    %26 = vector.broadcast %cst_14 : f32 to vector<64x128xf32>
    %27 = arith.maximumf %25, %26 : vector<64x128xf32>
    %28 = vector.extract_strided_slice %3 {offsets = [0, 128], sizes = [64, 128], strides = [1, 1]} : vector<64x256xf32> to vector<64x128xf32>
    %cst_15 = arith.constant 1.024000e+03 : f32
    %29 = vector.broadcast %cst_15 : f32 to vector<64x128xf32>
    %30 = arith.mulf %28, %29 : vector<64x128xf32>
    %31 = math.roundeven %30 : vector<64x128xf32>
    %cst_16 = arith.constant -3.276800e+04 : f32
    %cst_17 = arith.constant 3.276700e+04 : f32
    %32 = vector.broadcast %cst_16 : f32 to vector<64x128xf32>
    %33 = arith.maximumf %32, %31 : vector<64x128xf32>
    %34 = vector.broadcast %cst_17 : f32 to vector<64x128xf32>
    %35 = arith.minimumf %34, %33 : vector<64x128xf32>
    %cst_18 = arith.constant 9.765625E-4 : f32
    %36 = vector.broadcast %cst_18 : f32 to vector<64x128xf32>
    %37 = arith.mulf %35, %36 : vector<64x128xf32>
    %c0_19 = arith.constant 0 : index
    %c0_20 = arith.constant 0 : index
    %38 = vector.load %arg5[%c0_19, %c0_20] : memref<1x128xf32, #tpu.memory_space<vmem>>, vector<1x128xf32>
    %39 = vector.broadcast %38 : vector<1x128xf32> to vector<64x128xf32>
    %40 = arith.addf %37, %39 : vector<64x128xf32>
    %cst_21 = arith.constant 1.600000e+01 : f32
    %41 = vector.broadcast %cst_21 : f32 to vector<64x128xf32>
    %42 = arith.mulf %40, %41 : vector<64x128xf32>
    %43 = math.roundeven %42 : vector<64x128xf32>
    %cst_22 = arith.constant -1.280000e+02 : f32
    %cst_23 = arith.constant 1.270000e+02 : f32
    %44 = vector.broadcast %cst_22 : f32 to vector<64x128xf32>
    %45 = arith.maximumf %44, %43 : vector<64x128xf32>
    %46 = vector.broadcast %cst_23 : f32 to vector<64x128xf32>
    %47 = arith.minimumf %46, %45 : vector<64x128xf32>
    %cst_24 = arith.constant 6.250000e-02 : f32
    %48 = vector.broadcast %cst_24 : f32 to vector<64x128xf32>
    %49 = arith.mulf %47, %48 : vector<64x128xf32>
    %cst_25 = arith.constant 0.000000e+00 : bf16
    %50 = vector.broadcast %cst_25 : bf16 to vector<96x128xbf16>
    %c0_26 = arith.constant 0 : index
    %c0_27 = arith.constant 0 : index
    %51 = vector.load %arg10[%c0_26, %c0_27] : memref<96x128xbf16, #tpu.memory_space<vmem>>, vector<96x128xbf16>
    tpu.vector_store %arg10[%c0_26, %c0_27], %50 {strides = array<i32>} : memref<96x128xbf16, #tpu.memory_space<vmem>>, vector<96x128xbf16>,
    %52 = arith.truncf %27 : vector<64x128xf32> to vector<64x128xbf16>
    %c16 = arith.constant 16 : index
    %c0_28 = arith.constant 0 : index
    %53 = vector.load %arg10[%c16, %c0_28] : memref<96x128xbf16, #tpu.memory_space<vmem>>, vector<64x128xbf16>
    tpu.vector_store %arg10[%c16, %c0_28], %52 {strides = array<i32>} : memref<96x128xbf16, #tpu.memory_space<vmem>>, vector<64x128xbf16>,
    %54 = tpu.iota {dimensions = array<i32: 0>} : vector<64x128xi32>
    %c8_i32 = arith.constant 8 : i32
    %c0_i32 = arith.constant 0 : i32
    %55 = arith.cmpi eq, %c8_i32, %c0_i32 : i32
    %c1_i32 = arith.constant 1 : i32
    %56 = arith.select %55, %c1_i32, %c8_i32 : i32
    %57 = vector.broadcast %56 : i32 to vector<64x128xi32>
    %58 = arith.remsi %54, %57 : vector<64x128xi32>
    %c0_i32_29 = arith.constant 0 : i32
    %59 = vector.broadcast %c0_i32_29 : i32 to vector<64x128xi32>
    %60 = arith.cmpi ne, %58, %59 : vector<64x128xi32>
    %c0_i32_30 = arith.constant 0 : i32
    %61 = vector.broadcast %c0_i32_30 : i32 to vector<64x128xi32>
    %62 = arith.cmpi slt, %58, %61 : vector<64x128xi32>
    %c0_i32_31 = arith.constant 0 : i32
    %63 = arith.cmpi slt, %56, %c0_i32_31 : i32
    %64 = vector.broadcast %63 : i1 to vector<64x128xi1>
    %65 = vector.broadcast %64 : vector<64x128xi1> to vector<64x128xi1>
    %66 = arith.xori %62, %65 : vector<64x128xi1>
    %67 = arith.andi %66, %60 : vector<64x128xi1>
    %68 = vector.broadcast %56 : i32 to vector<64x128xi32>
    %69 = arith.addi %58, %68 : vector<64x128xi32>
    %70 = arith.select %67, %69, %58 : vector<64x128xi1>, vector<64x128xi32>
    %c0_i32_32 = arith.constant 0 : i32
    %71 = vector.broadcast %c0_i32_32 : i32 to vector<64x128xi32>
    %72 = arith.cmpi ne, %70, %71 : vector<64x128xi32>
    %c7_i32 = arith.constant 7 : i32
    %73 = vector.broadcast %c7_i32 : i32 to vector<64x128xi32>
    %74 = arith.cmpi ne, %70, %73 : vector<64x128xi32>
    %c7 = arith.constant 7 : index
    %c0_33 = arith.constant 0 : index
    %75 = vector.load %arg10[%c7, %c0_33] : memref<96x128xbf16, #tpu.memory_space<vmem>>, vector<64x128xbf16>
    %cst_34 = arith.constant 0.000000e+00 : bf16
    %76 = vector.broadcast %cst_34 : bf16 to vector<64x128xbf16>
    %77 = arith.select %72, %75, %76 : vector<64x128xi1>, vector<64x128xbf16>
    %c0_35 = arith.constant 0 : index
    %c0_36 = arith.constant 0 : index
    %78 = vector.load %arg11[%c0_35, %c0_36] : memref<64x1152xbf16, #tpu.memory_space<vmem>>, vector<64x128xbf16>
    tpu.vector_store %arg11[%c0_35, %c0_36], %77 {strides = array<i32>} : memref<64x1152xbf16, #tpu.memory_space<vmem>>, vector<64x128xbf16>,
    %c8 = arith.constant 8 : index
    %c0_37 = arith.constant 0 : index
    %79 = vector.load %arg10[%c8, %c0_37] : memref<96x128xbf16, #tpu.memory_space<vmem>>, vector<64x128xbf16>
    %c0_38 = arith.constant 0 : index
    %c128 = arith.constant 128 : index
    %80 = vector.load %arg11[%c0_38, %c128] : memref<64x1152xbf16, #tpu.memory_space<vmem>>, vector<64x128xbf16>
    tpu.vector_store %arg11[%c0_38, %c128], %79 {strides = array<i32>} : memref<64x1152xbf16, #tpu.memory_space<vmem>>, vector<64x128xbf16>,
    %c9 = arith.constant 9 : index
    %c0_39 = arith.constant 0 : index
    %81 = vector.load %arg10[%c9, %c0_39] : memref<96x128xbf16, #tpu.memory_space<vmem>>, vector<64x128xbf16>
    %cst_40 = arith.constant 0.000000e+00 : bf16
    %82 = vector.broadcast %cst_40 : bf16 to vector<64x128xbf16>
    %83 = arith.select %74, %81, %82 : vector<64x128xi1>, vector<64x128xbf16>
    %c0_41 = arith.constant 0 : index
    %c256 = arith.constant 256 : index
    %84 = vector.load %arg11[%c0_41, %c256] : memref<64x1152xbf16, #tpu.memory_space<vmem>>, vector<64x128xbf16>
    tpu.vector_store %arg11[%c0_41, %c256], %83 {strides = array<i32>} : memref<64x1152xbf16, #tpu.memory_space<vmem>>, vector<64x128xbf16>,
    %c15 = arith.constant 15 : index
    %c0_42 = arith.constant 0 : index
    %85 = vector.load %arg10[%c15, %c0_42] : memref<96x128xbf16, #tpu.memory_space<vmem>>, vector<64x128xbf16>
    %cst_43 = arith.constant 0.000000e+00 : bf16
    %86 = vector.broadcast %cst_43 : bf16 to vector<64x128xbf16>
    %87 = arith.select %72, %85, %86 : vector<64x128xi1>, vector<64x128xbf16>
    %c0_44 = arith.constant 0 : index
    %c384 = arith.constant 384 : index
    %88 = vector.load %arg11[%c0_44, %c384] : memref<64x1152xbf16, #tpu.memory_space<vmem>>, vector<64x128xbf16>
    tpu.vector_store %arg11[%c0_44, %c384], %87 {strides = array<i32>} : memref<64x1152xbf16, #tpu.memory_space<vmem>>, vector<64x128xbf16>,
    %c16_45 = arith.constant 16 : index
    %c0_46 = arith.constant 0 : index
    %89 = vector.load %arg10[%c16_45, %c0_46] : memref<96x128xbf16, #tpu.memory_space<vmem>>, vector<64x128xbf16>
    %c0_47 = arith.constant 0 : index
    %c512 = arith.constant 512 : index
    %90 = vector.load %arg11[%c0_47, %c512] : memref<64x1152xbf16, #tpu.memory_space<vmem>>, vector<64x128xbf16>
    tpu.vector_store %arg11[%c0_47, %c512], %89 {strides = array<i32>} : memref<64x1152xbf16, #tpu.memory_space<vmem>>, vector<64x128xbf16>,
    %c17 = arith.constant 17 : index
    %c0_48 = arith.constant 0 : index
    %91 = vector.load %arg10[%c17, %c0_48] : memref<96x128xbf16, #tpu.memory_space<vmem>>, vector<64x128xbf16>
    %cst_49 = arith.constant 0.000000e+00 : bf16
    %92 = vector.broadcast %cst_49 : bf16 to vector<64x128xbf16>
    %93 = arith.select %74, %91, %92 : vector<64x128xi1>, vector<64x128xbf16>
    %c0_50 = arith.constant 0 : index
    %c640 = arith.constant 640 : index
    %94 = vector.load %arg11[%c0_50, %c640] : memref<64x1152xbf16, #tpu.memory_space<vmem>>, vector<64x128xbf16>
    tpu.vector_store %arg11[%c0_50, %c640], %93 {strides = array<i32>} : memref<64x1152xbf16, #tpu.memory_space<vmem>>, vector<64x128xbf16>,
    %c23 = arith.constant 23 : index
    %c0_51 = arith.constant 0 : index
    %95 = vector.load %arg10[%c23, %c0_51] : memref<96x128xbf16, #tpu.memory_space<vmem>>, vector<64x128xbf16>
    %cst_52 = arith.constant 0.000000e+00 : bf16
    %96 = vector.broadcast %cst_52 : bf16 to vector<64x128xbf16>
    %97 = arith.select %72, %95, %96 : vector<64x128xi1>, vector<64x128xbf16>
    %c0_53 = arith.constant 0 : index
    %c768 = arith.constant 768 : index
    %98 = vector.load %arg11[%c0_53, %c768] : memref<64x1152xbf16, #tpu.memory_space<vmem>>, vector<64x128xbf16>
    tpu.vector_store %arg11[%c0_53, %c768], %97 {strides = array<i32>} : memref<64x1152xbf16, #tpu.memory_space<vmem>>, vector<64x128xbf16>,
    %c24 = arith.constant 24 : index
    %c0_54 = arith.constant 0 : index
    %99 = vector.load %arg10[%c24, %c0_54] : memref<96x128xbf16, #tpu.memory_space<vmem>>, vector<64x128xbf16>
    %c0_55 = arith.constant 0 : index
    %c896 = arith.constant 896 : index
    %100 = vector.load %arg11[%c0_55, %c896] : memref<64x1152xbf16, #tpu.memory_space<vmem>>, vector<64x128xbf16>
    tpu.vector_store %arg11[%c0_55, %c896], %99 {strides = array<i32>} : memref<64x1152xbf16, #tpu.memory_space<vmem>>, vector<64x128xbf16>,
    %c25 = arith.constant 25 : index
    %c0_56 = arith.constant 0 : index
    %101 = vector.load %arg10[%c25, %c0_56] : memref<96x128xbf16, #tpu.memory_space<vmem>>, vector<64x128xbf16>
    %cst_57 = arith.constant 0.000000e+00 : bf16
    %102 = vector.broadcast %cst_57 : bf16 to vector<64x128xbf16>
    %103 = arith.select %74, %101, %102 : vector<64x128xi1>, vector<64x128xbf16>
    %c0_58 = arith.constant 0 : index
    %c1024 = arith.constant 1024 : index
    %104 = vector.load %arg11[%c0_58, %c1024] : memref<64x1152xbf16, #tpu.memory_space<vmem>>, vector<64x128xbf16>
    tpu.vector_store %arg11[%c0_58, %c1024], %103 {strides = array<i32>} : memref<64x1152xbf16, #tpu.memory_space<vmem>>, vector<64x128xbf16>,
    %c0_59 = arith.constant 0 : index
    %c0_60 = arith.constant 0 : index
    %105 = vector.load %arg11[%c0_59, %c0_60] : memref<64x1152xbf16, #tpu.memory_space<vmem>>, vector<64x1152xbf16>
    %c0_61 = arith.constant 0 : index
    %c0_62 = arith.constant 0 : index
    %106 = vector.load %arg3[%c0_61, %c0_62] : memref<1152x128xbf16, #tpu.memory_space<vmem>>, vector<1152x128xbf16>
    %cst_63 = arith.constant dense<0.000000e+00> : vector<64x128xf32>
    %107 = tpu.matmul %105, %106, %cst_63 {dimension_numbers = #tpu.dot_dimension_numbers<[1], [0], [0], [1], [0, 0, 1, 1], [], []>} : vector<64x1152xbf16>, vector<1152x128xbf16>, vector<64x128xf32> -> vector<64x128xf32>
    %cst_64 = arith.constant 1.024000e+03 : f32
    %108 = vector.broadcast %cst_64 : f32 to vector<64x128xf32>
    %109 = arith.mulf %107, %108 : vector<64x128xf32>
    %110 = math.roundeven %109 : vector<64x128xf32>
    %cst_65 = arith.constant -3.276800e+04 : f32
    %cst_66 = arith.constant 3.276700e+04 : f32
    %111 = vector.broadcast %cst_65 : f32 to vector<64x128xf32>
    %112 = arith.maximumf %111, %110 : vector<64x128xf32>
    %113 = vector.broadcast %cst_66 : f32 to vector<64x128xf32>
    %114 = arith.minimumf %113, %112 : vector<64x128xf32>
    %cst_67 = arith.constant 9.765625E-4 : f32
    %115 = vector.broadcast %cst_67 : f32 to vector<64x128xf32>
    %116 = arith.mulf %114, %115 : vector<64x128xf32>
    %c0_68 = arith.constant 0 : index
    %c0_69 = arith.constant 0 : index
    %117 = vector.load %arg6[%c0_68, %c0_69] : memref<1x128xf32, #tpu.memory_space<vmem>>, vector<1x128xf32>
    %118 = vector.broadcast %117 : vector<1x128xf32> to vector<64x128xf32>
    %119 = arith.addf %116, %118 : vector<64x128xf32>
    %cst_70 = arith.constant 1.600000e+01 : f32
    %120 = vector.broadcast %cst_70 : f32 to vector<64x128xf32>
    %121 = arith.mulf %119, %120 : vector<64x128xf32>
    %122 = math.roundeven %121 : vector<64x128xf32>
    %cst_71 = arith.constant -1.280000e+02 : f32
    %cst_72 = arith.constant 1.270000e+02 : f32
    %123 = vector.broadcast %cst_71 : f32 to vector<64x128xf32>
    %124 = arith.maximumf %123, %122 : vector<64x128xf32>
    %125 = vector.broadcast %cst_72 : f32 to vector<64x128xf32>
    %126 = arith.minimumf %125, %124 : vector<64x128xf32>
    %cst_73 = arith.constant 6.250000e-02 : f32
    %127 = vector.broadcast %cst_73 : f32 to vector<64x128xf32>
    %128 = arith.mulf %126, %127 : vector<64x128xf32>
    %c0_74 = arith.constant 0 : index
    %c0_75 = arith.constant 0 : index
    %129 = vector.load %arg7[%c0_74, %c0_75] : memref<1x128xf32, #tpu.memory_space<vmem>>, vector<1x128xf32>
    %130 = vector.broadcast %129 : vector<1x128xf32> to vector<64x128xf32>
    %131 = arith.mulf %128, %130 : vector<64x128xf32>
    %c0_76 = arith.constant 0 : index
    %c0_77 = arith.constant 0 : index
    %132 = vector.load %arg8[%c0_76, %c0_77] : memref<1x128xf32, #tpu.memory_space<vmem>>, vector<1x128xf32>
    %133 = vector.broadcast %132 : vector<1x128xf32> to vector<64x128xf32>
    %134 = arith.mulf %49, %133 : vector<64x128xf32>
    %135 = arith.addf %131, %134 : vector<64x128xf32>
    %cst_78 = arith.constant 1.600000e+01 : f32
    %136 = vector.broadcast %cst_78 : f32 to vector<64x128xf32>
    %137 = arith.mulf %135, %136 : vector<64x128xf32>
    %138 = math.roundeven %137 : vector<64x128xf32>
    %cst_79 = arith.constant -1.280000e+02 : f32
    %cst_80 = arith.constant 1.270000e+02 : f32
    %139 = vector.broadcast %cst_79 : f32 to vector<64x128xf32>
    %140 = arith.maximumf %139, %138 : vector<64x128xf32>
    %141 = vector.broadcast %cst_80 : f32 to vector<64x128xf32>
    %142 = arith.minimumf %141, %140 : vector<64x128xf32>
    %cst_81 = arith.constant 6.250000e-02 : f32
    %143 = vector.broadcast %cst_81 : f32 to vector<64x128xf32>
    %144 = arith.mulf %142, %143 : vector<64x128xf32>
    %cst_82 = arith.constant 0.000000e+00 : f32
    %145 = vector.broadcast %cst_82 : f32 to vector<64x128xf32>
    %146 = arith.maximumf %144, %145 : vector<64x128xf32>
    %147 = arith.truncf %146 : vector<64x128xf32> to vector<64x128xbf16>
    %c0_83 = arith.constant 0 : index
    %c0_84 = arith.constant 0 : index
    %c0_85 = arith.constant 0 : index
    %148 = vector.load %arg9[%c0_83, %c0_84, %c0_85] : memref<1x64x128xbf16, #tpu.memory_space<vmem>>, vector<1x64x128xbf16>
    %149 = vector.shape_cast %148 : vector<1x64x128xbf16> to vector<64x128xbf16>
    %150 = vector.shape_cast %147 : vector<64x128xbf16> to vector<1x64x128xbf16>
    tpu.vector_store %arg9[%c0_83, %c0_84, %c0_85], %150 {strides = array<i32>} : memref<1x64x128xbf16, #tpu.memory_space<vmem>>, vector<1x64x128xbf16>,
    return
  }
  func.func @transform_0(%arg0: i32) -> (i32, i32, i32) {
    %c0_i32 = arith.constant 0 : i32
    %c0_i32_0 = arith.constant 0 : i32
    %c0_i32_1 = arith.constant 0 : i32
    return %arg0, %c0_i32, %c0_i32_0 : i32, i32, i32
  }
  func.func @transform_1(%arg0: i32) -> (i32, i32) {
    %c0_i32 = arith.constant 0 : i32
    %c0_i32_0 = arith.constant 0 : i32
    %c0_i32_1 = arith.constant 0 : i32
    return %c0_i32, %c0_i32_0 : i32, i32
  }
  func.func @transform_2(%arg0: i32) -> (i32, i32) {
    %c0_i32 = arith.constant 0 : i32
    %c0_i32_0 = arith.constant 0 : i32
    %c0_i32_1 = arith.constant 0 : i32
    return %c0_i32, %c0_i32_0 : i32, i32
  }
  func.func @transform_3(%arg0: i32) -> (i32, i32) {
    %c0_i32 = arith.constant 0 : i32
    %c0_i32_0 = arith.constant 0 : i32
    %c0_i32_1 = arith.constant 0 : i32
    return %c0_i32, %c0_i32_0 : i32, i32
  }
  func.func @transform_4(%arg0: i32) -> (i32, i32) {
    %c0_i32 = arith.constant 0 : i32
    %c0_i32_0 = arith.constant 0 : i32
    %c0_i32_1 = arith.constant 0 : i32
    return %c0_i32, %c0_i32_0 : i32, i32
  }
  func.func @transform_5(%arg0: i32) -> (i32, i32) {
    %c0_i32 = arith.constant 0 : i32
    %c0_i32_0 = arith.constant 0 : i32
    %c0_i32_1 = arith.constant 0 : i32
    return %c0_i32, %c0_i32_0 : i32, i32
  }
  func.func @transform_6(%arg0: i32) -> (i32, i32) {
    %c0_i32 = arith.constant 0 : i32
    %c0_i32_0 = arith.constant 0 : i32
    %c0_i32_1 = arith.constant 0 : i32
    return %c0_i32, %c0_i32_0 : i32, i32
  }
  func.func @transform_7(%arg0: i32) -> (i32, i32) {
    %c0_i32 = arith.constant 0 : i32
    %c0_i32_0 = arith.constant 0 : i32
    %c0_i32_1 = arith.constant 0 : i32
    return %c0_i32, %c0_i32_0 : i32, i32
  }
  func.func @transform_8(%arg0: i32) -> (i32, i32, i32) {
    %c0_i32 = arith.constant 0 : i32
    %c0_i32_0 = arith.constant 0 : i32
    %c0_i32_1 = arith.constant 0 : i32
    return %arg0, %c0_i32, %c0_i32_0 : i32, i32, i32
  }
}

</mosaic_0001>

<bundles_post_ra>
// kernel: resblock_forward.1
= control target key start
LH: loop header
LB: loop body
LE: loop exit
PB: predicated region body
PF: predicated region fallthrough
CT: control target
= control target key end

     0   :  { %s3219_s27 = smov 0   ;;  %s4109_s0 = inlined_call_operand.vmem [shape: bf16[2,64,128], index: 0, kind: input, shape index: {}]   ;;  %s4110_s1 = inlined_call_operand.vmem [shape: bf16[128,256], index: 1, kind: input, shape index: {}]   ;;  %s4111_s2 = inlined_call_operand.vmem [shape: bf16[1152,128], index: 2, kind: input, shape index: {}]   ;;  %s4112_s3 = inlined_call_operand.vmem [shape: f32[1,128], index: 3, kind: input, shape index: {}]   ;;  %s4113_s4 = inlined_call_operand.vmem [shape: f32[1,128], index: 4, kind: input, shape index: {}]   ;;  %s4114_s5 = inlined_call_operand.vmem [shape: f32[1,128], index: 5, kind: input, shape index: {}]   ;;  %s4115_s6 = inlined_call_operand.vmem [shape: f32[1,128], index: 6, kind: input, shape index: {}]   ;;  %s4116_s7 = inlined_call_operand.vmem [shape: f32[1,128], index: 7, kind: input, shape index: {}]   ;;  %s4117_s8 = inlined_call_operand.vmem [shape: bf16[2,64,128], index: 8, kind: output, shape index: {}]  }
   0x1 LB: > { %s2647_s28 = sadd.s32 4294967295, %s3171_s27   ;;  %p2651_p0 = scmp.ge.s32.totalorder %s3171_s27, 1  ;;  %s3171_s27 = sphi %s3219_s27, %s18_s27  }
   0x2   : > { %p262_p1 = scmp.lt.s32.totalorder %s3171_s27, 3 }
   0x4   : > { %p263_p2 = pnand %p2651_p0, %p262_p1 }
   0x5   : > { %v3065_v0 = vld [vmem:[%s4110_s1 + $0x4] ss:$8 sps:$4 sm:$0xff] (!%p263_p2)   ;;  %p296_p3 = scmp.lt.s32.totalorder (!%p263_p2), %s2647_s28, 1  ;;  %v3067_v1 = vld [vmem:[%s4110_s1] ss:$8 sps:$4 sm:$0xff] (!%p263_p2)   ;;  %v3173_v2 = vmov (!%p263_p2), 0   ;;  %v722_v55 = vlaneseq (!%p263_p2) }
   0x6   : > { %266 = sbr.rel (%p263_p2) target bundleno = 637 (0x27d), region = 52  ;;  %469 = vmatprep.mubr.bf16.mxu0 (!%p263_p2), %v3173_v2  ;;  %708 = vst [vmem:[#allocation2] sm:$0xff] (!%p263_p2), %v3173_v2  ;;  %713 = vst [vmem:[#allocation2 + $0x28] sm:$0xff] (!%p263_p2), %v3173_v2  ;;  %437 = vmatprep.subr.bf16.mxu0 (!%p263_p2), %v3065_v0  ;;  %v3068_v3 = vld [vmem:[%s4110_s1 + $0x14] ss:$8 sps:$4 sm:$0xff] (!%p263_p2)   ;;  %v3093_v21 = vld [vmem:[%s4111_s2 + $0x40] sm:$0xff] (!%p263_p2)  }
   0x7   : > { %438 = vmatpush1.bf16.msra.mxu0 (!%p263_p2), %v3067_v1  ;;  %v3070_v4 = vld [vmem:[%s4110_s1 + $0x10] ss:$8 sps:$4 sm:$0xff] (!%p263_p2)   ;;  %v3071_v5 = vld [vmem:[%s4110_s1 + $0x24] ss:$8 sps:$4 sm:$0xff] (!%p263_p2)   ;;  %v3073_v6 = vld [vmem:[%s4110_s1 + $0x20] ss:$8 sps:$4 sm:$0xff] (!%p263_p2)   ;;  %2804 = vmatprep.subr.bf16.mxu1 (!%p263_p2), %v3093_v21 }
   0x8   : > { %439 = vmatprep.subr.bf16.mxu0 (!%p263_p2), %v3068_v3  ;;  %v3074_v7 = vld [vmem:[%s4110_s1 + $0x34] ss:$8 sps:$4 sm:$0xff] (!%p263_p2)   ;;  %v3076_v8 = vld [vmem:[%s4110_s1 + $0x30] ss:$8 sps:$4 sm:$0xff] (!%p263_p2)   ;;  %v3077_v9 = vld [vmem:[%s4110_s1 + $0x44] ss:$8 sps:$4 sm:$0xff] (!%p263_p2)  }
   0x9   : > { %v3079_v10 = vld [vmem:[%s4110_s1 + $0x40] ss:$8 sps:$4 sm:$0xff] (!%p263_p2)   ;;  %v3080_v11 = vld [vmem:[%s4110_s1 + $0x54] ss:$8 sps:$4 sm:$0xff] (!%p263_p2)   ;;  %v3082_v12 = vld [vmem:[%s4110_s1 + $0x50] ss:$8 sps:$4 sm:$0xff] (!%p263_p2)  }
   0xa   : > { %v3083_v13 = vld [vmem:[%s4110_s1 + $0x64] ss:$8 sps:$4 sm:$0xff] (!%p263_p2)   ;;  %v3085_v14 = vld [vmem:[%s4110_s1 + $0x60] ss:$8 sps:$4 sm:$0xff] (!%p263_p2)   ;;  %v3086_v15 = vld [vmem:[%s4110_s1 + $0x74] ss:$8 sps:$4 sm:$0xff] (!%p263_p2)  }
   0xb   : > { %440 = vmatpush1.bf16.msra.mxu0 (!%p263_p2), %v3070_v4  ;;  %v3088_v16 = vld [vmem:[%s4110_s1 + $0x70] ss:$8 sps:$4 sm:$0xff] (!%p263_p2)   ;;  %v3094_v22 = vld [vmem:[%s4111_s2] sm:$0xff] (!%p263_p2)   ;;  %v3097_v25 = vld [vmem:[%s4111_s2 + $0x48] sm:$0xff] (!%p263_p2)   ;;  %v3391_v56 = vshrl.u32 (!%p263_p2), %v722_v55, 7 }
   0xc   : > { %441 = vmatprep.subr.bf16.mxu0 (!%p263_p2), %v3071_v5  ;;  %v3095_v23 = vld [vmem:[%s4111_s2 + $0xc0] sm:$0xff] (!%p263_p2)   ;;  %2805 = vmatpush3.bf16.msra.mxu1 (!%p263_p2), %v3094_v22  ;;  %v3098_v26 = vld [vmem:[%s4111_s2 + $0x8] sm:$0xff] (!%p263_p2)   ;;  %v3101_v29 = vld [vmem:[%s4111_s2 + $0x50] sm:$0xff] (!%p263_p2)  }
   0xd   : > { %s4147_s28 = smov (!%p296_p3, %s2647_s28), 1  ;;  %v3096_v24 = vld [vmem:[%s4111_s2 + $0x80] sm:$0xff]   ;;  %2806 = vmatprep.subr.bf16.mxu1 %v3097_v25  ;;  %v3099_v27 = vld [vmem:[%s4111_s2 + $0xc8] sm:$0xff]   ;;  %v3102_v30 = vld [vmem:[%s4111_s2 + $0x10] sm:$0xff]   ;;  %v724_v57 = vadd.s32 8, %v3391_v56  ;;  %v725_v58 = vadd.s32 16, %v3391_v56 }
   0xe   : > { %s2771_s17 = sshll.u32 %s4147_s28, 5  ;;  %v3100_v28 = vld [vmem:[%s4111_s2 + $0x88] sm:$0xff]   ;;  %v3103_v31 = vld [vmem:[%s4111_s2 + $0xd0] sm:$0xff]   ;;  %v3105_v33 = vld [vmem:[%s4111_s2 + $0x58] sm:$0xff]   ;;  %v726_v59 = vadd.s32 24, %v3391_v56  ;;  %v735_v60 = vand.u32 7, %v3391_v56 }
   0xf   : > { %s300_s24 = scalar_lea.vmem %s4109_s0, %s2771_s17  ;;  %442 = vmatpush1.bf16.msra.mxu0 %v3073_v6  ;;  %v3104_v32 = vld [vmem:[%s4111_s2 + $0x90] sm:$0xff]   ;;  %v3106_v34 = vld [vmem:[%s4111_s2 + $0x18] sm:$0xff]   ;;  %v3109_v37 = vld [vmem:[%s4111_s2 + $0x60] sm:$0xff]   ;;  %v742_v61 = vand.u32 7, %v724_v57  ;;  %v749_v62 = vand.u32 7, %v725_v58  ;;  %s305_s9 = scalar_lea.vmem %s4117_s8, %s2771_s17 }
  0x10   : > { %443 = vmatprep.subr.bf16.mxu0 %v3074_v7  ;;  %v3089_v17 = vld [vmem:[%s300_s24] sm:$0xff]   ;;  %v3090_v18 = vld [vmem:[%s300_s24 + $0x8] sm:$0xff]   ;;  %v3091_v19 = vld [vmem:[%s300_s24 + $0x10] sm:$0xff]   ;;  %2807 = vmatpush3.bf16.msra.mxu1 %v3098_v26  ;;  %v756_v63 = vand.u32 7, %v726_v59  ;;  %vm827_vm0 = vcmp.ne.s32.totalorder %v735_v60, 0  ;;  %vm835_vm8 = vcmp.ne.s32.totalorder %v735_v60, 7 }
  0x11   : > { %v3092_v20 = vld [vmem:[%s300_s24 + $0x18] sm:$0xff]   ;;  %2808 = vmatprep.subr.bf16.mxu1 %v3101_v29  ;;  %v3110_v38 = vld [vmem:[%s4111_s2 + $0x20] sm:$0xff]   ;;  %v3113_v41 = vld [vmem:[%s4111_s2 + $0x68] sm:$0xff]   ;;  %vm828_vm1 = vcmp.ne.s32.totalorder %v742_v61, 0  ;;  %vm829_vm2 = vcmp.ne.s32.totalorder %v749_v62, 0  ;;  %vm836_vm9 = vcmp.ne.s32.totalorder %v742_v61, 7 }
  0x12   : > { %v3107_v35 = vld [vmem:[%s4111_s2 + $0xd8] sm:$0xff]   ;;  %v3111_v39 = vld [vmem:[%s4111_s2 + $0xe0] sm:$0xff]   ;;  %v3114_v42 = vld [vmem:[%s4111_s2 + $0x28] sm:$0xff]   ;;  %vm830_vm4 = vcmp.ne.s32.totalorder %v756_v63, 0  ;;  %vm3407_vm12 = vcmp.ne.s32.totalorder %v749_v62, 7  ;;  %vm3413_vm13 = vcmp.ne.s32.totalorder %v756_v63, 7 }
  0x13   : > { %444 = vmatpush1.bf16.msra.mxu0 %v3076_v8  ;;  %v3108_v36 = vld [vmem:[%s4111_s2 + $0x98] sm:$0xff]   ;;  %v3112_v40 = vld [vmem:[%s4111_s2 + $0xa0] sm:$0xff]   ;;  %v3115_v43 = vld [vmem:[%s4111_s2 + $0xe8] sm:$0xff]  }
  0x14   : > { %445 = vmatprep.subr.bf16.mxu0 %v3077_v9  ;;  %2809 = vmatpush3.bf16.msra.mxu1 %v3102_v30  ;;  %v3116_v44 = vld [vmem:[%s4111_s2 + $0xa8] sm:$0xff]   ;;  %v3117_v45 = vld [vmem:[%s4111_s2 + $0x70] sm:$0xff]   ;;  %v3121_v49 = vld [vmem:[%s4111_s2 + $0x78] sm:$0xff]  }
  0x15   : > { %2810 = vmatprep.subr.bf16.mxu1 %v3105_v33  ;;  %v3118_v46 = vld [vmem:[%s4111_s2 + $0x30] sm:$0xff]   ;;  %v3122_v50 = vld [vmem:[%s4111_s2 + $0x38] sm:$0xff]   ;;  %v3125_v53 = vld [vmem:[%s4111_s2 + $0x140] sm:$0xff]  }
  0x16   : > { %v3119_v47 = vld [vmem:[%s4111_s2 + $0xf0] sm:$0xff]   ;;  %v3123_v51 = vld [vmem:[%s4111_s2 + $0xf8] sm:$0xff]   ;;  %v3127_v54 = vld [vmem:[%s4111_s2 + $0x1c0] sm:$0xff]  }
  0x17   : > { %446 = vmatpush1.bf16.msra.mxu0 %v3079_v10  ;;  %v3120_v48 = vld [vmem:[%s4111_s2 + $0xb0] sm:$0xff]   ;;  %v3124_v52 = vld [vmem:[%s4111_s2 + $0xb8] sm:$0xff]   ;;  %vm848_vm3 = vmpackc.low %vm827_vm0, %vm827_vm0  ;;  %vm876_vm0 = vsmask.f32 3328 }
  0x18   : > { %447 = vmatprep.subr.bf16.mxu0 %v3080_v11  ;;  %2811 = vmatpush3.bf16.msra.mxu1 %v3106_v34  ;;  %vm849_vm5 = vmpackc.low %vm828_vm1, %vm828_vm1  ;;  %v856_v0 = vsel %vm848_vm3, 65537, %v3173_v2  ;;  %v3440_v34 = vadd.s32 32, %v3391_v56 }
  0x19   : > { %2812 = vmatprep.subr.bf16.mxu1 %v3109_v37  ;;  %vm850_vm6 = vmpackc.low %vm829_vm2, %vm829_vm2  ;;  %v857_v1 = vsel %vm849_vm5, 65537, %v3173_v2  ;;  %v3442_v37 = vld [vmem:[#allocation2] sm:$0xf0]  ;;  %vm1138_vm2 = vsmask.f32 7424 }
  0x1a   : > { %vm851_vm7 = vmpackc.low %vm830_vm4, %vm830_vm4  ;;  %v858_v3 = vsel %vm850_vm6, 65537, %v3173_v2  ;;  %v2678_v5 = vcombine.low %v856_v0, %v857_v1 }
  0x1b   : > { %448 = vmatpush1.bf16.msra.mxu0 %v3082_v12  ;;  %v859_v4 = vsel %vm851_vm7, 65537, %v3173_v2  ;;  %vm1008_vm10 = vmpackc.low %vm835_vm8, %vm835_vm8 }
  0x1c   : > { %449 = vmatprep.subr.bf16.mxu0 %v3083_v13  ;;  %2813 = vmatpush3.bf16.msra.mxu1 %v3110_v38  ;;  %vm1009_vm11 = vmpackc.low %vm836_vm9, %vm836_vm9  ;;  %v3401_v6 = vcombine.low %v858_v3, %v859_v4  ;;  %v878_v7 = vshrl.u32 %v2678_v5, 16  ;;  %v881_v8 = vshll.u32 %v2678_v5, 16  ;;  %v1016_v9 = vsel %vm1008_vm10, 65537, %v3173_v2 }
  0x1d   : > { %2814 = vmatprep.subr.bf16.mxu1 %v3113_v41  ;;  %v1017_v10 = vsel %vm1009_vm11, 65537, %v3173_v2  ;;  %vm1010_vm14 = vmpackc.low %vm3407_vm12, %vm3407_vm12  ;;  %vm922_vm9 = vsmask.f32 4352 }
  0x1e   : > { %v886_v11 = vshrl.u32 %v3401_v6, 16  ;;  %v889_v12 = vshll.u32 %v3401_v6, 16  ;;  %v880_v13 = vrot.slane %v878_v7, 4  ;;  %vm1011_vm15 = vmpackc.low %vm3413_vm13, %vm3413_vm13  ;;  %v1018_v33 = vsel %vm1010_vm14, 65537, %v3173_v2 }
  0x1f   : > { %450 = vmatpush1.bf16.msra.mxu0 %v3085_v14  ;;  %v883_v14 = vrot.slane %v881_v8, 5 }
  0x20   : > { %451 = vmatprep.subr.bf16.mxu0 %v3086_v15  ;;  %2815 = vmatpush3.bf16.msra.mxu1 %v3114_v42  ;;  %v888_v22 = vrot.slane %v886_v11, 4 }
  0x21   : > { %2816 = vmatprep.subr.bf16.mxu1 %v3117_v45  ;;  %v3426_v25 = vor.u32 %v883_v14, %v880_v13  ;;  %v1133_v13 = vld [vmem:[#allocation2] sm:$0x80] }
  0x23   : > { %452 = vmatpush1.bf16.msra.mxu0 %v3088_v16  ;;  %v3411_v16 = vcombine.low %v1016_v9, %v1017_v10  ;;  %vm912_vm1 = vcmp.ne.s16.totalorder %v3426_v25, 0 }
  0x24   : > { %2844 = vmatprep.subr.bf16.mxu0 %v3095_v23  ;;  %2817 = vmatpush3.bf16.msra.mxu1 %v3118_v46  ;;  %v891_v23 = vrot.slane %v889_v12, 5  ;;  %v3458_v46 = vld [vmem:[%s4112_s3] ss:$0 sm:$0xff] }
  0x25   : > { %2818 = vmatprep.subr.bf16.mxu1 %v3121_v49  ;;  %v1037_v26 = vshrl.u32 %v3411_v16, 16 }
  0x26   : > { %470 = vmatmul.mubr.bf16.vlgmr.msra.gmra.mrb[0].mxu0 %v3089_v17  ;;  %v3444_v38 = vor.u32 %v891_v23, %v888_v22 }
  0x27   : > { %479 = vmatprep.mubr.bf16.mxu0 %v3173_v2  ;;  %2845 = vmatpush3.bf16.msra.mxu0 %v3096_v24  ;;  %v1039_v41 = vrot.slane %v1037_v26, 3 }
  0x28   : > { %2846 = vmatprep.subr.bf16.mxu0 %v3099_v27  ;;  %2819 = vmatpush3.bf16.msra.mxu1 %v3122_v50  ;;  %v1040_v27 = vshll.u32 %v3411_v16, 16  ;;  %v763_v50 = vand.u32 7, %v3440_v34  ;;  %v3471_v58 = vsel %vm876_vm0, %v3426_v25, %v3444_v38  ;;  %v729_v34 = vadd.s32 48, %v3391_v56  ;;  %v3148_v25 = vld [vmem:[%s4111_s2 + $0x1a8] sm:$0xff]  }
  0x29   : > { %2884 = vmatprep.subr.bf16.mxu1 %v3125_v53 }
  0x2a   : > { %v1042_v42 = vrot.slane %v1040_v27, 4  ;;  %vm3484_vm4 = vcmp.ne.s32.totalorder %v763_v50, 0  ;;  %vm3532_vm10 = vcmp.ne.s32.totalorder %v763_v50, 7 }
  0x2b   : > { %2847 = vmatpush3.bf16.msra.mxu0 %v3100_v28  ;;  %vm852_vm7 = vmpackc.low %vm3484_vm4, %vm3484_vm4 }
  0x2c   : > { %2848 = vmatprep.subr.bf16.mxu0 %v3103_v31  ;;  %v3477_v60 = vor.u32 %v1042_v42, %v1039_v41  ;;  %vm1012_vm12 = vmpackc.low %vm3532_vm10, %vm3532_vm10 }
  0x2e   : > { %480 = vmatmul.mubr.bf16.gmra.mrb[4].mxu0 %v3090_v18  ;;  %vm4119_vm5 = vcmp.ne.s16.totalorder %v3477_v60, 0 }
  0x2f   : > { %489 = vmatprep.mubr.bf16.mxu0 %v3173_v2  ;;  %2849 = vmatpush3.bf16.msra.mxu0 %v3104_v32  ;;  %v3436_v32 = vrot.slane %v889_v12, 1 }
  0x30   : > { %2850 = vmatprep.subr.bf16.mxu0 %v3107_v35 }
  0x33   : > { %2851 = vmatpush3.bf16.msra.mxu0 %v3108_v36 }
  0x34   : > { %2852 = vmatprep.subr.bf16.mxu0 %v3111_v39  ;;  %v1019_v39 = vsel %vm1011_vm15, 65537, %v3173_v2 }
  0x35   : > { %v3461_v49 = vcombine.low %v1018_v33, %v1019_v39 }
  0x36   : > { %490 = vmatmul.mubr.bf16.gmra.mrb[8].mxu0 %v3091_v19  ;;  %v3417_v19 = vrot.slane %v881_v8, 1 }
  0x37   : > { %499 = vmatprep.mubr.bf16.mxu0 %v3173_v2  ;;  %2853 = vmatpush3.bf16.msra.mxu0 %v3112_v40  ;;  %v843_v40 = vld [vmem:[#allocation2] sm:$0xf8]  ;;  %v1045_v14 = vshrl.u32 %v3461_v49, 16  ;;  %v1048_v15 = vshll.u32 %v3461_v49, 16 }
  0x38   : > { %2854 = vmatprep.subr.bf16.mxu0 %v3115_v43  ;;  %v1140_v31 = vor.u32 %v3417_v19, %v878_v7  ;;  %v3453_v43 = vadd.s32 40, %v3391_v56  ;;  %v917_v55 = vsel %vm912_vm1, %v843_v40, 0  ;;  %vm1150_vm3 = vcmp.ne.s16.totalorder %v3417_v19, 0 }
  0x39   : > { %v924_v4 = vshrl.u32 %v917_v55, 16  ;;  %v927_v5 = vshll.u32 %v917_v55, 16  ;;  %v3502_v33 = vsel %vm1150_vm3, %v1133_v13, 0  ;;  %v1047_v19 = vrot.slane %v1045_v14, 3 }
  0x3a   : > { %v3475_v59 = vsel %vm1138_vm2, %v1140_v31, %v3436_v32  ;;  %v770_v61 = vand.u32 7, %v3453_v43  ;;  %v1050_v43 = vrot.slane %v1048_v15, 4 }
  0x3b   : > { %2855 = vmatpush3.bf16.msra.mxu0 %v3116_v44  ;;  %v3498_v31 = vrot.slane %v927_v5, 4 }
  0x3c   : > { %2856 = vmatprep.subr.bf16.mxu0 %v3119_v47  ;;  %vm3492_vm6 = vcmp.ne.s32.totalorder %v770_v61, 0  ;;  %vm3540_vm11 = vcmp.ne.s32.totalorder %v770_v61, 7  ;;  %v3544_v17 = vor.u32 %v1050_v43, %v1047_v19  ;;  %v1020_v19 = vsel %vm1012_vm12, 65537, %v3173_v2 }
  0x3d   : > { %vm853_vm8 = vmpackc.low %vm3492_vm6, %vm3492_vm6  ;;  %vm985_vm12 = vcmask 1043456  }
  0x3e   : > { %500 = vmatmul.mubr.bf16.gmra.mrb[12].mxu0 %v3092_v20  ;;  %vm1013_vm14 = vmpackc.low %vm3540_vm11, %vm3540_vm11  ;;  %vm913_vm11 = vcmp.ne.s16.totalorder %v3471_v58, 0  ;;  %v3153_v58 = vld [vmem:[%s4111_s2 + $0x178] sm:$0xff]  }
  0x3f   : > { %2857 = vmatpush3.bf16.msra.mxu0 %v3120_v48  ;;  %v986_v48 = vrot.slane %v3442_v37, 4 }
  0x40   : > { %2858 = vmatprep.subr.bf16.mxu0 %v3123_v51 }
  0x43   : > { %2859 = vmatpush3.bf16.msra.mxu0 %v3124_v52 }
  0x44   : > { %2924 = vmatprep.subr.bf16.mxu0 %v3127_v54 }
  0xf9   : > { %v471_v18 = vpop.f32.mrb[0].mxu0 }
  0xfa   : > { %v510_v20 = vmul.f32 1024.0, %v471_v18  ;;  %v3419_v21 = vpop.f32.mrb[1].mxu0 }
  0xfb   : > { %v475_v24 = vpop.f32.mrb[2].mxu0 }
  0xfc   : > { %v3000_v28 = vround.rtne.f32 %v510_v20  ;;  %v511_v29 = vmul.f32 1024.0, %v475_v24  ;;  %v3433_v30 = vpop.f32.mrb[3].mxu0  ;;  %v1003_v24 = vld [vmem:[#allocation2] sm:$0xf0] }
  0xfe   : > { %v526_v35 = vmax.f32 %v3000_v28, -32768.0  ;;  %v3001_v36 = vround.rtne.f32 %v511_v29  ;;  %v3496_v29 = vrot.slane %v924_v4, 3 }
 0x100   : > { %v534_v44 = vmin.f32 %v526_v35, 32767.0  ;;  %v527_v45 = vmax.f32 %v3001_v36, -32768.0 }
 0x101   : > { %v481_v47 = vpop.f32.mrb[4].mxu0 }
 0x102   : > { %v542_v51 = vmul.f32 0.0009765625, %v534_v44  ;;  %v535_v52 = vmin.f32 %v527_v45, 32767.0  ;;  %v512_v53 = vmul.f32 1024.0, %v481_v47  ;;  %v3464_v54 = vpop.f32.mrb[5].mxu0  ;;  %v3519_v44 = vsel %vm4119_vm5, %v1003_v24, 0 }
 0x103   : > { %v485_v57 = vpop.f32.mrb[6].mxu0  ;;  %v730_v45 = vadd.s32 56, %v3391_v56  ;;  %v777_v56 = vand.u32 7, %v729_v34 }
 0x104   : > { %v557_v62 = vadd.f32 %v3458_v46, %v542_v51  ;;  %v543_v63 = vmul.f32 0.0009765625, %v535_v52  ;;  %v3002_v0 = vround.rtne.f32 %v512_v53  ;;  %v513_v1 = vmul.f32 1024.0, %v485_v57  ;;  %v3481_v3 = vpop.f32.mrb[7].mxu0 }
 0x105   : > { %v860_v57 = vsel %vm852_vm7, 65537, %v3173_v2  ;;  %vm3552_vm13 = vcmp.ne.s32.totalorder %v777_v56, 0  ;;  %vm3567_vm3 = vcmp.ne.s32.totalorder %v777_v56, 7 }
 0x106   : > { %v565_v8 = vmul.f32 16.0, %v557_v62  ;;  %v558_v9 = vadd.f32 %v3458_v46, %v543_v63  ;;  %v528_v10 = vmax.f32 %v3002_v0, -32768.0  ;;  %v3003_v12 = vround.rtne.f32 %v513_v1  ;;  %vm854_vm4 = vmpackc.low %vm3552_vm13, %vm3552_vm13 }
 0x107   : > { %v861_v62 = vsel %vm853_vm8, 65537, %v3173_v2  ;;  %vm1014_vm8 = vmpackc.low %vm3567_vm3, %vm3567_vm3  ;;  %vm1160_vm13 = vsmask.f32 256 }
 0x108   : > { %v3008_v18 = vround.rtne.f32 %v565_v8  ;;  %v566_v20 = vmul.f32 16.0, %v558_v9  ;;  %v536_v22 = vmin.f32 %v528_v10, 32767.0  ;;  %v529_v23 = vmax.f32 %v3003_v12, -32768.0 }
 0x109   : > { %v491_v28 = vpop.f32.mrb[8].mxu0  ;;  %v930_v8 = vor.u32 %v3498_v31, %v3496_v29  ;;  %v1162_v9 = vshrl.u32 %v3502_v33, 16  ;;  %v784_v10 = vand.u32 7, %v730_v45 }
 0x10a   : > { %v581_v35 = vmax.f32 %v3008_v18, -128.0  ;;  %v3009_v36 = vround.rtne.f32 %v566_v20  ;;  %v544_v39 = vmul.f32 0.0009765625, %v536_v22  ;;  %v537_v40 = vmin.f32 %v529_v23, 32767.0  ;;  %v3508_v41 = vpop.f32.mrb[9].mxu0 }
 0x10b   : > { %v495_v42 = vpop.f32.mrb[10].mxu0  ;;  %v1082_v22 = vshrl.u32 %v3519_v44, 16  ;;  %v3550_v23 = vcombine.low %v860_v57, %v861_v62  ;;  %vm3563_vm15 = vcmp.ne.s32.totalorder %v784_v10, 0  ;;  %v1021_v62 = vsel %vm1013_vm14, 65537, %v3173_v2 }
 0x10c   : > { %v589_v47 = vmin.f32 %v581_v35, 127.0  ;;  %v582_v51 = vmax.f32 %v3009_v36, -128.0  ;;  %v559_v52 = vadd.f32 %v3458_v46, %v544_v39  ;;  %v545_v53 = vmul.f32 0.0009765625, %v537_v40  ;;  %v3523_v55 = vpop.f32.mrb[11].mxu0  ;;  %vm855_vm7 = vmpackc.low %vm3563_vm15, %vm3563_vm15 }
 0x10d   : > { %v514_v35 = vmul.f32 1024.0, %v491_v28  ;;  %v1085_v40 = vshll.u32 %v3519_v44, 16  ;;  %v515_v57 = vmul.f32 1024.0, %v495_v42  ;;  %v895_v44 = vshrl.u32 %v3550_v23, 16 }
 0x10e   : > { %v597_v0 = vmul.f32 0.0625, %v589_v47  ;;  %v590_v1 = vmin.f32 %v582_v51, 127.0  ;;  %v567_v4 = vmul.f32 16.0, %v559_v52  ;;  %v560_v5 = vadd.f32 %v3458_v46, %v545_v53 }
 0x10f   : > { %v3004_v52 = vround.rtne.f32 %v514_v35  ;;  %vm3580_vm6 = vcmp.ne.s32.totalorder %v784_v10, 7  ;;  %v3005_v42 = vround.rtne.f32 %v515_v57  ;;  %v3595_v7 = vrot.slane %v1082_v22, 4 }
 0x110   : > { %v598_v50 = vmul.f32 0.0625, %v590_v1  ;;  %v3010_v12 = vround.rtne.f32 %v567_v4  ;;  %v568_v13 = vmul.f32 16.0, %v560_v5  ;;  %v605_v18 = vmax.f32 %v597_v0, 0.0  ;;  %vm1015_vm10 = vmpackc.low %vm3580_vm6, %vm3580_vm6 }
 0x111   : > { %v501_v20 = vpop.f32.mrb[12].mxu0  ;;  %v530_v1 = vmax.f32 %v3004_v52, -32768.0  ;;  %v3585_v4 = vrot.slane %v1162_v9, 7  ;;  %v3593_v5 = vsel %vm922_vm9, %v3477_v60, %v3544_v17  ;;  %v898_v10 = vshll.u32 %v3550_v23, 16 }
 0x112   : > { %v606_v24 = vmax.f32 %v598_v50, 0.0  ;;  %v583_v33 = vmax.f32 %v3010_v12, -128.0  ;;  %v3011_v34 = vround.rtne.f32 %v568_v13  ;;  %v3556_v36 = vpop.f32.mrb[13].mxu0  ;;  %v3601_v12 = vrot.slane %v1085_v40, 5 }
 0x113   : > { %v505_v39 = vpop.f32.mrb[14].mxu0  ;;  %v538_v50 = vmin.f32 %v530_v1, 32767.0  ;;  %v3603_v13 = vcombine.low %v1020_v19, %v1021_v62  ;;  %v897_v22 = vrot.slane %v895_v44, 4  ;;  %v516_v19 = vmul.f32 1024.0, %v501_v20 }
 0x114   : > { %v3571_v28 = vpack.c.bf16 %v606_v24, %v605_v18  ;;  %v591_v47 = vmin.f32 %v583_v33, 127.0  ;;  %v584_v51 = vmax.f32 %v3011_v34, -128.0  ;;  %v3573_v53 = vpop.f32.mrb[15].mxu0  ;;  %v531_v18 = vmax.f32 %v3005_v42, -32768.0 }
 0x115   : > { %v862_v24 = vsel %vm854_vm4, 65537, %v3173_v2  ;;  %v863_v33 = vsel %vm855_vm7, 65537, %v3173_v2  ;;  %v546_v40 = vmul.f32 0.0009765625, %v538_v50  ;;  %v1023_v52 = vsel %vm1015_vm10, 65537, %v3173_v2 }
 0x116   : > { %718 = vst [vmem:[#allocation2 + $0x8] sm:$0xff] %v3571_v28  ;;  %v599_v56 = vmul.f32 0.0625, %v591_v47  ;;  %v592_v0 = vmin.f32 %v584_v51, 127.0  ;;  %v539_v43 = vmin.f32 %v531_v18, 32767.0  ;;  %v900_v47 = vrot.slane %v898_v10, 5 }
 0x117   : > { %v1022_v51 = vsel %vm1014_vm8, 65537, %v3173_v2  ;;  %v561_v57 = vadd.f32 %v3458_v46, %v546_v40  ;;  %v3006_v62 = vround.rtne.f32 %v516_v19  ;;  %v3627_v63 = vcombine.low %v862_v24, %v863_v33 }
 0x118   : > { %v600_v9 = vmul.f32 0.0625, %v592_v0  ;;  %v607_v34 = vmax.f32 %v599_v56, 0.0  ;;  %v547_v56 = vmul.f32 0.0009765625, %v539_v43  ;;  %v517_v20 = vmul.f32 1024.0, %v505_v39 }
 0x119   : > { %v1054_v0 = vshrl.u32 %v3603_v13, 16  ;;  %v1057_v1 = vshll.u32 %v3603_v13, 16  ;;  %v569_v45 = vmul.f32 16.0, %v561_v57  ;;  %v532_v42 = vmax.f32 %v3006_v62, -32768.0 }
 0x11a   : > { %v608_v35 = vmax.f32 %v600_v9, 0.0  ;;  %v1143_v2 = vor.u32 %v3436_v32, %v886_v11  ;;  %v3635_v9 = vcombine.low %v1022_v51, %v1023_v52  ;;  %v562_v50 = vadd.f32 %v3458_v46, %v547_v56 }
 0x11b   : > { %v3007_v18 = vround.rtne.f32 %v517_v20  ;;  %v1088_v39 = vor.u32 %v3601_v12, %v3595_v7  ;;  %v901_v24 = vor.u32 %v900_v47, %v897_v22  ;;  %v3012_v33 = vround.rtne.f32 %v569_v45  ;;  %v3132_v12 = vld [vmem:[%s4111_s2 + $0x188] sm:$0xff]  }
 0x11c   : > { %v3624_v61 = vpack.c.bf16 %v608_v35, %v607_v34  ;;  %v540_v34 = vmin.f32 %v532_v42, 32767.0  ;;  %v904_v35 = vshrl.u32 %v3627_v63, 16  ;;  %v907_v40 = vshll.u32 %v3627_v63, 16 }
 0x11d   : > { %v570_v6 = vmul.f32 16.0, %v562_v50  ;;  %v533_v19 = vmax.f32 %v3007_v18, -32768.0  ;;  %v1056_v11 = vrot.slane %v1054_v0, 3  ;;  %v1059_v32 = vrot.slane %v1057_v1, 4 }
 0x11e   : > { %719 = vst [vmem:[#allocation2 + $0x10] sm:$0xff] %v3624_v61  ;;  %v585_v43 = vmax.f32 %v3012_v33, -128.0  ;;  %v548_v51 = vmul.f32 0.0009765625, %v540_v34  ;;  %v1063_v22 = vshrl.u32 %v3635_v9, 16  ;;  %v4118_v47 = vshll.u32 %v3635_v9, 16 }
 0x11f   : > { %v3013_v52 = vround.rtne.f32 %v570_v6  ;;  %v541_v57 = vmin.f32 %v533_v19, 32767.0  ;;  %v1144_v62 = vrot.slane %v898_v10, 1  ;;  %v1218_v56 = vrot.slane %v1037_v26, 7 }
 0x120   : > { %v593_v20 = vmin.f32 %v585_v43, 127.0  ;;  %v563_v45 = vadd.f32 %v3458_v46, %v548_v51  ;;  %v906_v42 = vrot.slane %v904_v35, 4  ;;  %v909_v50 = vrot.slane %v907_v40, 5 }
 0x121   : > { %v586_v18 = vmax.f32 %v3013_v52, -128.0  ;;  %v549_v33 = vmul.f32 0.0009765625, %v541_v57  ;;  %vm1151_vm14 = vcmp.ne.s16.totalorder %v3475_v59, 0  ;;  %v3657_v34 = vsel %vm876_vm0, %v3444_v38, %v901_v24  ;;  %v3126_v59 = vld [vmem:[%s4111_s2 + $0x100] sm:$0xff]  }
 0x122   : > { %v3661_v10 = vrot.slane %v1045_v14, 7  ;;  %v571_v26 = vmul.f32 16.0, %v563_v45  ;;  %v1060_v6 = vor.u32 %v1059_v32, %v1056_v11  ;;  %v1065_v19 = vrot.slane %v1063_v22, 3 }
 0x123   : > { %v1068_v43 = vrot.slane %v4118_v47, 4  ;;  %v601_v51 = vmul.f32 0.0625, %v593_v20  ;;  %v594_v52 = vmin.f32 %v586_v18, 127.0  ;;  %v564_v57 = vadd.f32 %v3458_v46, %v549_v33 }
 0x124   : > { %vm4121_vm15 = vcmp.ne.s16.totalorder %v3593_v5, 0  ;;  %v3671_v38 = vor.u32 %v1218_v56, %v1040_v27  ;;  %v3014_v14 = vround.rtne.f32 %v571_v26  ;;  %v3674_v45 = vsel %vm1138_vm2, %v1143_v2, %v1144_v62 }
 0x125   : > { %v3676_v11 = vor.u32 %v909_v50, %v906_v42  ;;  %v1146_v32 = vor.u32 %v1144_v62, %v895_v44  ;;  %v602_v47 = vmul.f32 0.0625, %v594_v52  ;;  %v572_v20 = vmul.f32 16.0, %v564_v57 }
 0x126   : > { %vm914_vm3 = vcmp.ne.s16.totalorder %v3657_v34, 0  ;;  %v1147_v46 = vrot.slane %v907_v40, 1  ;;  %v1221_v16 = vor.u32 %v3661_v10, %v1048_v15  ;;  %v587_v27 = vmax.f32 %v3014_v14, -128.0 }
 0x127   : > { %v987_v18 = vrot.slane %v3571_v28, 4  ;;  %v3687_v2 = vsel %vm922_vm9, %v3544_v17, %v1060_v6  ;;  %v3689_v42 = vor.u32 %v1068_v43, %v1065_v19  ;;  %v609_v23 = vmax.f32 %v601_v51, 0.0 }
 0x128   : > { %v610_v44 = vmax.f32 %v602_v47, 0.0  ;;  %v3015_v62 = vround.rtne.f32 %v572_v20  ;;  %v918_v40 = vsel %vm913_vm11, %v3571_v28, 0  ;;  %vm1152_vm4 = vcmp.ne.s16.totalorder %v3674_v45, 0  ;;  %v3133_v45 = vld [vmem:[%s4111_s2 + $0x150] sm:$0xff]  }
 0x129   : > { %v595_v49 = vmin.f32 %v587_v27, 127.0  ;;  %v988_v15 = vsel %vm985_vm12, %v986_v48, %v987_v18  ;;  %v3700_v17 = vsel %vm876_vm0, %v901_v24, %v3676_v11  ;;  %v3704_v50 = vrot.slane %v1054_v0, 7 }
 0x12a   : > { %v3706_v47 = vpack.c.bf16 %v610_v44, %v609_v23  ;;  %v588_v33 = vmax.f32 %v3015_v62, -128.0  ;;  %2078 = vmatprep.mubr.bf16.mxu1 %v988_v15  ;;  %v932_v26 = vshrl.u32 %v918_v40, 16  ;;  %v3709_v19 = vsel %vm1160_vm13, %v1218_v56, %v1221_v16  ;;  %v3129_v44 = vld [vmem:[%s4111_s2 + $0x148] sm:$0xff]  }
 0x12b   : > { %v603_v43 = vmul.f32 0.0625, %v595_v49  ;;  %v935_v37 = vshll.u32 %v918_v40, 16  ;;  %v3712_v48 = vsel %vm1138_vm2, %v1146_v32, %v1147_v46  ;;  %v3716_v24 = vsel %vm922_vm9, %v1060_v6, %v3689_v42 }
 0x12c   : > { %720 = vst [vmem:[#allocation2 + $0x18] sm:$0xff] %v3706_v47  ;;  %v596_v0 = vmin.f32 %v588_v33, 127.0  ;;  %v934_v51 = vrot.slane %v932_v26, 3  ;;  %vm4120_vm6 = vcmp.ne.s16.totalorder %v3687_v2, 0  ;;  %vm915_vm7 = vcmp.ne.s16.totalorder %v3700_v17, 0 }
 0x12d   : > { %v937_v52 = vrot.slane %v935_v37, 4  ;;  %v1156_v56 = vsel %vm1151_vm14, %v3571_v28, 0  ;;  %v3726_v57 = vor.u32 %v1147_v46, %v904_v35  ;;  %v1224_v6 = vor.u32 %v3704_v50, %v1057_v1 }
 0x12e   : > { %v611_v14 = vmax.f32 %v603_v43, 0.0  ;;  %v604_v32 = vmul.f32 0.0625, %v596_v0  ;;  %v1166_v20 = vshrl.u32 %v1156_v56, 16  ;;  %vm1153_vm8 = vcmp.ne.s16.totalorder %v3712_v48, 0 }
 0x12f   : > { %vm1074_vm10 = vcmp.ne.s16.totalorder %v3716_v24, 0  ;;  %v3733_v16 = vor.u32 %v937_v52, %v934_v51  ;;  %v1169_v27 = vshll.u32 %v1156_v56, 16  ;;  %v1077_v13 = vsel %vm4121_vm15, %v3571_v28, 0  ;;  %v3128_v51 = vld [vmem:[%s4111_s2 + $0x180] sm:$0xff]  }
 0x130   : > { %v989_v63 = vrot.slane %v3624_v61, 4  ;;  %v612_v1 = vmax.f32 %v604_v32, 0.0  ;;  %v3742_v35 = vrot.slane %v1166_v20, 7  ;;  %v1090_v46 = vshrl.u32 %v1077_v13, 16 }
 0x131   : > { %v1093_v23 = vshll.u32 %v1077_v13, 16  ;;  %v939_v62 = vsel %vm922_vm9, %v930_v8, %v3733_v16  ;;  %v919_v28 = vsel %vm914_vm3, %v3624_v61, 0  ;;  %vm1154_vm14 = vcmp.ne.s16.totalorder %v3726_v57, 0  ;;  %v3130_v8 = vld [vmem:[%s4111_s2 + $0x108] sm:$0xff]   ;;  %v3142_v57 = vld [vmem:[%s4111_s2 + $0x120] sm:$0xff]  }
 0x132   : > { %v990_v40 = vsel %vm985_vm12, %v987_v18, %v989_v63  ;;  %v3759_v49 = vsel %vm1160_vm13, %v3661_v10, %v1224_v6  ;;  %v3761_v15 = vpack.c.bf16 %v612_v1, %v611_v14  ;;  %2079 = vmatmul.mubr.bf16.vlgmr.msra.gmra.mrb[0].mxu1 %v939_v62  ;;  %v1171_v33 = vor.u32 %v1169_v27, %v3742_v35 }
 0x133   : > { %v1092_v29 = vrot.slane %v1090_v46, 4  ;;  %v1095_v31 = vrot.slane %v1093_v23, 5  ;;  %vm916_vm5 = vcmp.ne.s16.totalorder %v3676_v11, 0  ;;  %2885 = vmatpush3.bf16.msra.mxu1 %v3126_v59  ;;  %2086 = vmatprep.mubr.bf16.mxu1 %v990_v40  ;;  %v941_v18 = vshrl.u32 %v919_v28, 16  ;;  %v3134_v46 = vld [vmem:[%s4111_s2 + $0x110] sm:$0xff]   ;;  %v3162_v11 = vld [vmem:[%s4111_s2 + $0x228] sm:$0xff]  }
 0x134   : > { %v944_v26 = vshll.u32 %v919_v28, 16  ;;  %v1157_v10 = vsel %vm1152_vm4, %v3624_v61, 0  ;;  %v1078_v43 = vsel %vm4120_vm6, %v3624_v61, 0  ;;  %721 = vst [vmem:[#allocation2 + $0x20] sm:$0xff] %v3761_v15  ;;  %v1172_v37 = vsel %vm1160_vm13, %v3585_v4, %v1171_v33  ;;  %2886 = vmatprep.subr.bf16.mxu1 %v3129_v44  ;;  %v3131_v4 = vld [vmem:[%s4111_s2 + $0x1c8] sm:$0xff]  }
 0x135   : > { %v1096_v0 = vor.u32 %v1095_v31, %v1092_v29  ;;  %v1174_v52 = vshrl.u32 %v1157_v10, 16  ;;  %v3785_v56 = vrot.slane %v1063_v22, 7  ;;  %2143 = vmatprep.mubr.bf16.mxu0 %v1172_v37  ;;  %v943_v6 = vrot.slane %v941_v18, 3  ;;  %v3135_v31 = vld [vmem:[%s4111_s2 + $0x1d0] sm:$0xff]  }
 0x136   : > { %v946_v14 = vrot.slane %v944_v26, 4  ;;  %v1099_v32 = vshrl.u32 %v1078_v43, 16  ;;  %v1102_v20 = vshll.u32 %v1078_v43, 16  ;;  %vm1075_vm4 = vcmp.ne.s16.totalorder %v3689_v42, 0  ;;  %v3136_v26 = vld [vmem:[%s4111_s2 + $0x190] sm:$0xff]  }
 0x137   : > { %vm1229_vm6 = vcmp.ne.s16.totalorder %v3671_v38, 0  ;;  %v1097_v27 = vsel %vm876_vm0, %v1088_v39, %v1096_v0  ;;  %v3796_v22 = vrot.slane %v1174_v52, 7  ;;  %v1177_v59 = vshll.u32 %v1157_v10, 16  ;;  %2887 = vmatpush3.bf16.msra.mxu1 %v3130_v8  ;;  %v3137_v8 = vld [vmem:[%s4111_s2 + $0x158] sm:$0xff]  }
 0x138   : > { %v991_v13 = vrot.slane %v3706_v47, 4  ;;  %2144 = vmatmul.mubr.bf16.vlgmr.msra.gmra.mrb[16].mxu0 %v1097_v27  ;;  %v947_v1 = vor.u32 %v946_v14, %v943_v6  ;;  %v1101_v23 = vrot.slane %v1099_v32, 4  ;;  %v1104_v44 = vrot.slane %v1102_v20, 5  ;;  %2888 = vmatprep.subr.bf16.mxu1 %v3133_v45  ;;  %v3138_v10 = vld [vmem:[%s4111_s2 + $0x118] sm:$0xff]  }
 0x139   : > { %v920_v7 = vsel %vm915_vm7, %v3706_v47, 0  ;;  %vm1230_vm15 = vcmp.ne.s16.totalorder %v3709_v19, 0  ;;  %2925 = vmatpush3.bf16.msra.mxu0 %v3128_v51  ;;  %v1179_v39 = vor.u32 %v1177_v59, %v3796_v22  ;;  %v1158_v18 = vsel %vm1153_vm8, %v3706_v47, 0  ;;  %v3139_v45 = vld [vmem:[%s4111_s2 + $0x1d8] sm:$0xff]   ;;  %v3144_v19 = vld [vmem:[%s4111_s2 + $0x1a0] sm:$0xff]  }
 0x13a   : > { %v992_v62 = vsel %vm985_vm12, %v989_v63, %v991_v13  ;;  %v950_v40 = vshrl.u32 %v920_v7, 16  ;;  %v953_v28 = vshll.u32 %v920_v7, 16  ;;  %2926 = vmatprep.subr.bf16.mxu0 %v3131_v4  ;;  %v948_v33 = vsel %vm922_vm9, %v3733_v16, %v947_v1 }
 0x13b   : > { %v1105_v29 = vor.u32 %v1104_v44, %v1101_v23  ;;  %v1079_v63 = vsel %vm1074_vm10, %v3706_v47, 0  ;;  %2087 = vmatmul.mubr.bf16.gmra.mrb[4].mxu1 %v948_v33  ;;  %v1180_v16 = vsel %vm1160_vm13, %v3742_v35, %v1179_v39  ;;  %v1182_v48 = vshrl.u32 %v1158_v18, 16  ;;  %v3141_v35 = vld [vmem:[%s4111_s2 + $0x160] sm:$0xff]  }
 0x13c   : > { %v952_v43 = vrot.slane %v950_v40, 3  ;;  %v955_v37 = vrot.slane %v953_v28, 4  ;;  %2151 = vmatprep.mubr.bf16.mxu0 %v1180_v16  ;;  %2889 = vmatpush3.bf16.msra.mxu1 %v3134_v46  ;;  %v1185_v52 = vshll.u32 %v1158_v18, 16  ;;  %v1108_v4 = vshrl.u32 %v1079_v63, 16  ;;  %v979_v14 = vld [vmem:[#allocation2 + $0x20] sm:$0xf] }
 0x13d   : > { %v1106_v51 = vsel %vm876_vm0, %v1096_v0, %v1105_v29  ;;  %v1111_v6 = vshll.u32 %v1079_v63, 16  ;;  %2927 = vmatpush3.bf16.msra.mxu0 %v3132_v12  ;;  %2094 = vmatprep.mubr.bf16.mxu1 %v992_v62  ;;  %v1184_v20 = vrot.slane %v1182_v48, 7  ;;  %v993_v27 = vrot.slane %v979_v14, 4  ;;  %v847_v59 = vld [vmem:[#allocation2 + $0x20] sm:$0xf]  ;;  %v3845_v46 = vld [vmem:[#allocation2 + $0x8] sm:$0xff] }
 0x13e   : > { %v3840_v32 = vor.u32 %v955_v37, %v952_v43  ;;  %v1159_v0 = vsel %vm1154_vm14, %v3761_v15, 0  ;;  %2928 = vmatprep.subr.bf16.mxu0 %v3135_v31  ;;  %2890 = vmatprep.subr.bf16.mxu1 %v3137_v8  ;;  %v1110_v23 = vrot.slane %v1108_v4, 4  ;;  %v921_v7 = vsel %vm916_vm5, %v847_v59, 0  ;;  %v1007_v39 = vld [vmem:[#allocation2 + $0x20] sm:$0x1f]  ;;  %v3857_v63 = vld [vmem:[#allocation2 + $0x10] sm:$0xff] }
 0x13f   : > { %v1113_v44 = vrot.slane %v1111_v6, 5  ;;  %v1190_v12 = vshrl.u32 %v1159_v0, 16  ;;  %v1187_v40 = vor.u32 %v1185_v52, %v1184_v20  ;;  %v994_v28 = vsel %vm985_vm12, %v991_v13, %v993_v27  ;;  %v3145_v16 = vld [vmem:[%s4111_s2 + $0x168] sm:$0xff]   ;;  %v3887_v59 = vld [vmem:[#allocation2 + $0x18] sm:$0xff] }
 0x140   : > { %v957_v62 = vsel %vm922_vm9, %v947_v1, %v3840_v32  ;;  %v959_v33 = vshrl.u32 %v921_v7, 16  ;;  %2152 = vmatmul.mubr.bf16.gmra.mrb[20].mxu0 %v1106_v51  ;;  %2891 = vmatpush3.bf16.msra.mxu1 %v3138_v10  ;;  %v962_v31 = vshll.u32 %v921_v7, 16  ;;  %v1193_v18 = vshll.u32 %v1159_v0, 16  ;;  %v3140_v1 = vld [vmem:[%s4111_s2 + $0x198] sm:$0xff]   ;;  %v3149_v0 = vld [vmem:[%s4111_s2 + $0x170] sm:$0xff]  }
 0x141   : > { %v3855_v15 = vor.u32 %v1113_v44, %v1110_v23  ;;  %v1192_v8 = vrot.slane %v1190_v12, 7  ;;  %2929 = vmatpush3.bf16.msra.mxu0 %v3136_v26  ;;  %2892 = vmatprep.subr.bf16.mxu1 %v3141_v35  ;;  %v1188_v13 = vsel %vm1160_vm13, %v3796_v22, %v1187_v40  ;;  %v1080_v43 = vsel %vm1075_vm4, %v1007_v39, 0  ;;  %v3143_v22 = vld [vmem:[%s4111_s2 + $0x1e0] sm:$0xff]  }
 0x142   : > { %v961_v10 = vrot.slane %v959_v33, 3  ;;  %v1234_v26 = vsel %vm1229_vm6, %v3845_v46, 0  ;;  %2930 = vmatprep.subr.bf16.mxu0 %v3139_v45  ;;  %2159 = vmatprep.mubr.bf16.mxu0 %v1188_v13  ;;  %v964_v48 = vrot.slane %v962_v31, 4  ;;  %v1117_v35 = vshrl.u32 %v1080_v43, 16  ;;  %v1283_v45 = vld [vmem:[#allocation2 + $0x8] sm:$0xf8] }
 0x143   : > { %v1115_v37 = vsel %vm876_vm0, %v1105_v29, %v3855_v15  ;;  %v1195_v51 = vor.u32 %v1193_v18, %v1192_v8  ;;  %2095 = vmatmul.mubr.bf16.gmra.mrb[8].mxu1 %v957_v62  ;;  %v1120_v52 = vshll.u32 %v1080_v43, 16  ;;  %v3880_v4 = vsel %vm1230_vm15, %v3857_v63, 0  ;;  %v3146_v29 = vld [vmem:[%s4111_s2 + $0x128] sm:$0xff]  }
 0x144   : > { %v1242_v38 = vshll.u32 %v1234_v26, 16  ;;  %2893 = vmatpush3.bf16.msra.mxu1 %v3142_v57  ;;  %2102 = vmatprep.mubr.bf16.mxu1 %v994_v28  ;;  %v965_v6 = vor.u32 %v964_v48, %v961_v10  ;;  %v1247_v27 = vshll.u32 %v3880_v4, 16  ;;  %vm1231_vm6 = vcmp.ne.s16.totalorder %v3759_v49, 0  ;;  %v3147_v49 = vld [vmem:[%s4111_s2 + $0x1e8] sm:$0xff]   ;;  %v3150_v57 = vld [vmem:[%s4111_s2 + $0x130] sm:$0xff]  }
 0x145   : > { %v1196_v14 = vsel %vm1160_vm13, %v1184_v20, %v1195_v51  ;;  %2931 = vmatpush3.bf16.msra.mxu0 %v3140_v1  ;;  %2894 = vmatprep.subr.bf16.mxu1 %v3145_v16  ;;  %v1119_v23 = vrot.slane %v1117_v35, 4  ;;  %v1122_v44 = vrot.slane %v1120_v52, 5  ;;  %v4142_v20 = vshll.u32 %v3635_v9, 16  ;;  %v1345_v16 = vld [vmem:[#allocation2 + $0x8] sm:$0xf0]  ;;  %v3152_v51 = vld [vmem:[%s4111_s2 + $0x1b0] sm:$0xff]  }
 0x146   : > { %v1244_v7 = vrot.slane %v1242_v38, 1  ;;  %2932 = vmatprep.subr.bf16.mxu0 %v3143_v22  ;;  %v1288_v39 = vsel %vm912_vm1, %v1283_v45, 0  ;;  %v1240_v62 = vshrl.u32 %v1234_v26, 16  ;;  %v1249_v40 = vrot.slane %v1247_v27, 1  ;;  %v3932_v22 = vld [vmem:[#allocation2 + $0x20] sm:$0xff]  ;;  %v3155_v52 = vld [vmem:[%s4111_s2 + $0x1f8] sm:$0xff]  }
 0x147   : > { %v1227_v12 = vor.u32 %v3785_v56, %v4142_v20  ;;  %v3905_v28 = vsel %vm1231_vm6, %v3887_v59, 0  ;;  %v1289_v33 = vsel %vm913_vm11, %v3624_v61, 0  ;;  %v966_v9 = vsel %vm922_vm9, %v3840_v32, %v965_v6  ;;  %v3151_v32 = vld [vmem:[%s4111_s2 + $0x1f0] sm:$0xff]   ;;  %v3157_v38 = vld [vmem:[%s4111_s2 + $0x200] sm:$0xff]  }
 0x148   : > { %2160 = vmatmul.mubr.bf16.gmra.mrb[24].mxu0 %v1115_v37  ;;  %2895 = vmatpush3.bf16.msra.mxu1 %v3146_v29  ;;  %v1123_v31 = vor.u32 %v1122_v44, %v1119_v23  ;;  %v1245_v8 = vor.u32 %v1244_v7, %v1240_v62  ;;  %v1255_v18 = vshll.u32 %v3905_v28, 16  ;;  %v1294_v1 = vshrl.u32 %v1288_v39, 16  ;;  %v3154_v37 = vld [vmem:[%s4111_s2 + $0x138] sm:$0xff]   ;;  %v3158_v7 = vld [vmem:[%s4111_s2 + $0x208] sm:$0xff]  }
 0x149   : > { %2933 = vmatpush3.bf16.msra.mxu0 %v3144_v19  ;;  %2896 = vmatprep.subr.bf16.mxu1 %v3149_v0  ;;  %v1228_v61 = vsel %vm1160_vm13, %v3704_v50, %v1227_v12  ;;  %v1297_v10 = vshll.u32 %v1288_v39, 16  ;;  %v1302_v43 = vshrl.u32 %v1289_v33, 16  ;;  %v1305_v26 = vshll.u32 %v1289_v33, 16 }
 0x14a   : > { %2934 = vmatprep.subr.bf16.mxu0 %v3147_v49  ;;  %2167 = vmatprep.mubr.bf16.mxu0 %v1196_v14  ;;  %v1250_v13 = vsel %vm1138_vm2, %v1245_v8, %v1249_v40  ;;  %v1356_v50 = vrot.slane %v3857_v63, 4  ;;  %vm1232_vm1 = vcmp.ne.s16.totalorder %v1228_v61, 0  ;;  %v1124_v48 = vsel %vm876_vm0, %v3855_v15, %v1123_v31 }
 0x14b   : > { %2103 = vmatmul.mubr.bf16.gmra.mrb[12].mxu1 %v966_v9  ;;  %v1355_v35 = vrot.slane %v1345_v16, 4  ;;  %v1251_v45 = vshrl.u32 %v3880_v4, 16  ;;  %v1257_v29 = vrot.slane %v1255_v18, 1  ;;  %v1296_v6 = vrot.slane %v1294_v1, 3  ;;  %v3156_v4 = vld [vmem:[%s4111_s2 + $0x1b8] sm:$0xff]   ;;  %v3159_v9 = vld [vmem:[%s4111_s2 + $0x210] sm:$0xff]  }
 0x14c   : > { %2897 = vmatpush3.bf16.msra.mxu1 %v3150_v57  ;;  %2208 = vmatprep.mubr.bf16.mxu1 %v1250_v13  ;;  %v1299_v15 = vrot.slane %v1297_v10, 4  ;;  %v1304_v14 = vrot.slane %v1302_v43, 3  ;;  %v1307_v27 = vrot.slane %v1305_v26, 4  ;;  %v1237_v19 = vsel %vm1232_vm1, %v3932_v22, 0  ;;  %v1287_v13 = vld [vmem:[#allocation2 + $0x28] sm:$0xf] }
 0x14d   : > { %2935 = vmatpush3.bf16.msra.mxu0 %v3148_v25  ;;  %2898 = vmatprep.subr.bf16.mxu1 %v3153_v58  ;;  %v1357_v0 = vsel %vm985_vm12, %v1355_v35, %v1356_v50  ;;  %v1253_v23 = vor.u32 %v1251_v45, %v1249_v40  ;;  %v1290_v44 = vsel %vm914_vm3, %v3887_v59, 0  ;;  %v1263_v12 = vshll.u32 %v1237_v19, 16  ;;  %v1217_v40 = vld [vmem:[#allocation2 + $0x28] sm:$0x1]  ;;  %v1372_v43 = vld [vmem:[#allocation2 + $0x8] sm:$0xf0] }
 0x14e   : > { %2936 = vmatprep.subr.bf16.mxu0 %v3151_v32  ;;  %vm1233_vm11 = vcmp.ne.s16.totalorder %v3785_v56, 0  ;;  %v1300_v34 = vor.u32 %v1299_v15, %v1296_v6  ;;  %v1308_v49 = vor.u32 %v1307_v27, %v1304_v14  ;;  %v1311_v39 = vshrl.u32 %v1290_v44, 16  ;;  %v1349_v14 = vld [vmem:[#allocation2 + $0x28] sm:$0xf] }
 0x14f   : > { %v1258_v20 = vsel %vm1138_vm2, %v1253_v23, %v1257_v29  ;;  %v1314_v62 = vshll.u32 %v1290_v44, 16  ;;  %v1358_v33 = vrot.slane %v3887_v59, 4  ;;  %v1259_v57 = vshrl.u32 %v3905_v28, 16  ;;  %v3160_v28 = vld [vmem:[%s4111_s2 + $0x218] sm:$0xff]  }
 0x150   : > { %2168 = vmatmul.mubr.bf16.gmra.mrb[28].mxu0 %v1124_v48  ;;  %2899 = vmatpush3.bf16.msra.mxu1 %v3154_v37  ;;  %v1265_v56 = vrot.slane %v1263_v12, 1  ;;  %v1238_v25 = vsel %vm1233_vm11, %v1217_v40, 0  ;;  %v1313_v31 = vrot.slane %v1311_v39, 3  ;;  %v1291_v58 = vsel %vm915_vm7, %v3932_v22, 0  ;;  %v3161_v48 = vld [vmem:[%s4111_s2 + $0x220] sm:$0xff]  }
 0x151   : > { %2937 = vmatpush3.bf16.msra.mxu0 %v3152_v51  ;;  %2273 = vmatprep.mubr.bf16.mxu0 %v1357_v0  ;;  %v1316_v8 = vrot.slane %v1314_v62, 4  ;;  %v1359_v61 = vsel %vm985_vm12, %v1356_v50, %v1358_v33  ;;  %v1261_v32 = vor.u32 %v1259_v57, %v1257_v29  ;;  %v1271_v18 = vshll.u32 %v1238_v25, 16  ;;  %v1376_v25 = vld [vmem:[#allocation2 + $0x28] sm:$0x1f] }
 0x152   : > { %2938 = vmatprep.subr.bf16.mxu0 %v3155_v52  ;;  %2976 = vmatprep.subr.bf16.mxu1 %v3157_v38  ;;  %v1320_v1 = vshrl.u32 %v1291_v58, 16  ;;  %v1323_v10 = vshll.u32 %v1291_v58, 16  ;;  %v1360_v26 = vrot.slane %v3932_v22, 4  ;;  %v1267_v50 = vshrl.u32 %v1237_v19, 16 }
 0x153   : > { %2209 = vmatmul.mubr.bf16.vlgmr.msra.gmra.mrb[16].mxu1 %v3845_v46  ;;  %v1309_v46 = vsel %vm922_vm9, %v1300_v34, %v1308_v49  ;;  %v1266_v16 = vsel %vm1138_vm2, %v1261_v32, %v1265_v56  ;;  %v1317_v17 = vor.u32 %v1316_v8, %v1313_v31  ;;  %vm4143_vm13 = vcmp.ne.s16.totalorder %v3593_v5, 0  ;;  %v3164_v31 = vld [vmem:[%s4111_s2 + $0x238] sm:$0xff]  }
 0x154   : > { %2977 = vmatpush3.bf16.msra.mxu1 %v3157_v38  ;;  %2216 = vmatprep.mubr.bf16.mxu1 %v1258_v20  ;;  %v1378_v37 = vsel %vm4143_vm13, %v3857_v63, 0  ;;  %v1292_v51 = vsel %vm916_vm5, %v1287_v13, 0  ;;  %v1269_v35 = vor.u32 %v1267_v50, %v1265_v56  ;;  %v1273_v52 = vrot.slane %v1271_v18, 1 }
 0x155   : > { %2939 = vmatpush3.bf16.msra.mxu0 %v3156_v4  ;;  %2978 = vmatprep.subr.bf16.mxu1 %v3158_v7  ;;  %v1322_v38 = vrot.slane %v1320_v1, 3  ;;  %vm4144_vm15 = vcmp.ne.s16.totalorder %v3477_v60, 0  ;;  %v1318_v29 = vsel %vm922_vm9, %v1308_v49, %v1317_v17  ;;  %v1325_v6 = vrot.slane %v1323_v10, 4 }
 0x156   : > { %v1377_v45 = vsel %vm4144_vm15, %v1372_v43, 0  ;;  %v1391_v15 = vshrl.u32 %v1378_v37, 16  ;;  %v1394_v5 = vshll.u32 %v1378_v37, 16  ;;  %vm4145_vm5 = vcmp.ne.s16.totalorder %v3687_v2, 0  ;;  %v3163_v2 = vld [vmem:[%s4111_s2 + $0x230] sm:$0xff]  }
 0x157   : > { %v1383_v27 = vshrl.u32 %v1377_v45, 16  ;;  %v1386_v19 = vshll.u32 %v1377_v45, 16  ;;  %v1379_v60 = vsel %vm4145_vm5, %v3706_v47, 0  ;;  %v1329_v0 = vshrl.u32 %v1292_v51, 16 }
 0x158   : > { %2274 = vmatmul.mubr.bf16.vlgmr.msra.gmra.mrb[32].mxu0 %v1309_v46  ;;  %2979 = vmatpush3.bf16.msra.mxu1 %v3158_v7  ;;  %v1332_v23 = vshll.u32 %v1292_v51, 16  ;;  %v1274_v44 = vsel %vm1138_vm2, %v1269_v35, %v1273_v52  ;;  %v1326_v4 = vor.u32 %v1325_v6, %v1322_v38  ;;  %v1393_v7 = vrot.slane %v1391_v15, 4 }
 0x159   : > { %2281 = vmatprep.mubr.bf16.mxu0 %v1359_v61  ;;  %2980 = vmatprep.subr.bf16.mxu1 %v3159_v9  ;;  %v1396_v20 = vrot.slane %v1394_v5, 5  ;;  %v1362_v12 = vrot.slane %v1349_v14, 4  ;;  %v1380_v34 = vsel %vm1074_vm10, %v3932_v22, 0  ;;  %v1385_v47 = vrot.slane %v1383_v27, 4 }
 0x15a   : > { %v1388_v49 = vrot.slane %v1386_v19, 5  ;;  %v1334_v39 = vrot.slane %v1332_v23, 4  ;;  %v1400_v62 = vshrl.u32 %v1379_v60, 16  ;;  %v1403_v40 = vshll.u32 %v1379_v60, 16 }
 0x15b   : > { %2217 = vmatmul.mubr.bf16.gmra.mrb[20].mxu1 %v3857_v63  ;;  %v1361_v63 = vsel %vm985_vm12, %v1358_v33, %v1360_v26  ;;  %v1327_v33 = vsel %vm922_vm9, %v1317_v17, %v1326_v4  ;;  %v1409_v57 = vshrl.u32 %v1380_v34, 16  ;;  %v1412_v56 = vshll.u32 %v1380_v34, 16 }
 0x15c   : > { %2981 = vmatpush3.bf16.msra.mxu1 %v3159_v9  ;;  %2224 = vmatprep.mubr.bf16.mxu1 %v1266_v16  ;;  %v1397_v9 = vor.u32 %v1396_v20, %v1393_v7  ;;  %v1363_v24 = vsel %vm985_vm12, %v1360_v26, %v1362_v12  ;;  %v1389_v46 = vor.u32 %v1388_v49, %v1385_v47  ;;  %v1402_v58 = vrot.slane %v1400_v62, 4 }
 0x15d   : > { %2982 = vmatprep.subr.bf16.mxu1 %v3160_v28  ;;  %v1405_v61 = vrot.slane %v1403_v40, 5  ;;  %v1414_v18 = vrot.slane %v1412_v56, 5  ;;  %v1381_v1 = vsel %vm1075_vm4, %v1376_v25, 0 }
 0x15e   : > { %v1398_v32 = vsel %vm876_vm0, %v1389_v46, %v1397_v9  ;;  %v1418_v16 = vshrl.u32 %v1381_v1, 16  ;;  %v1421_v17 = vshll.u32 %v1381_v1, 16  ;;  %v613_v46 = vmul.f32 1024.0, %v3419_v21 }
 0x15f   : > { %v1406_v13 = vor.u32 %v1405_v61, %v1402_v58  ;;  %v614_v1 = vmul.f32 1024.0, %v3433_v30 }
 0x160   : > { %2282 = vmatmul.mubr.bf16.gmra.mrb[36].mxu0 %v1318_v29  ;;  %2983 = vmatpush3.bf16.msra.mxu1 %v3160_v28  ;;  %v1411_v28 = vrot.slane %v1409_v57, 4  ;;  %v1420_v26 = vrot.slane %v1418_v16, 4  ;;  %v1423_v50 = vrot.slane %v1421_v17, 5 }
 0x161   : > { %2289 = vmatprep.mubr.bf16.mxu0 %v1361_v63  ;;  %2984 = vmatprep.subr.bf16.mxu1 %v3161_v48 }
 0x162   : > { %v1415_v43 = vor.u32 %v1414_v18, %v1411_v28  ;;  %v1424_v42 = vor.u32 %v1423_v50, %v1420_v26  ;;  %v617_v26 = vmul.f32 1024.0, %v3508_v41  ;;  %v618_v50 = vmul.f32 1024.0, %v3523_v55 }
 0x163   : > { %2225 = vmatmul.mubr.bf16.gmra.mrb[24].mxu1 %v3887_v59  ;;  %v1331_v59 = vrot.slane %v1329_v0, 3 }
 0x164   : > { %2985 = vmatpush3.bf16.msra.mxu1 %v3161_v48  ;;  %2232 = vmatprep.mubr.bf16.mxu1 %v1274_v44  ;;  %v1416_v37 = vsel %vm876_vm0, %v1406_v13, %v1415_v43  ;;  %v1425_v48 = vsel %vm876_vm0, %v1415_v43, %v1424_v42  ;;  %v616_v43 = vmul.f32 1024.0, %v3481_v3  ;;  %v619_v42 = vmul.f32 1024.0, %v3556_v36 }
 0x165   : > { %2986 = vmatprep.subr.bf16.mxu1 %v3162_v11  ;;  %v1335_v8 = vor.u32 %v1334_v39, %v1331_v59 }
 0x166   : > { %v3022_v41 = vround.rtne.f32 %v619_v42 }
 0x167   : > { %v1336_v10 = vsel %vm922_vm9, %v1326_v4, %v1335_v8 }
 0x168   : > { %2290 = vmatmul.mubr.bf16.gmra.mrb[40].mxu0 %v1327_v33  ;;  %2987 = vmatpush3.bf16.msra.mxu1 %v3162_v11 }
 0x169   : > { %2297 = vmatprep.mubr.bf16.mxu0 %v1363_v24  ;;  %2988 = vmatprep.subr.bf16.mxu1 %v3163_v2 }
 0x16b   : > { %2233 = vmatmul.mubr.bf16.gmra.mrb[28].mxu1 %v3932_v22  ;;  %v1407_v22 = vsel %vm876_vm0, %v1397_v9, %v1406_v13  ;;  %v615_v13 = vmul.f32 1024.0, %v3464_v54  ;;  %v620_v54 = vmul.f32 1024.0, %v3573_v53 }
 0x16c   : > { %2989 = vmatpush3.bf16.msra.mxu1 %v3163_v2  ;;  %2992 = vmatprep.mubr.bf16.mxu1 %v1398_v32 }
 0x16d   : > { %2990 = vmatprep.subr.bf16.mxu1 %v3164_v31  ;;  %v3018_v30 = vround.rtne.f32 %v615_v13 }
 0x170   : > { %2298 = vmatmul.mubr.bf16.gmra.mrb[44].mxu0 %v1336_v10  ;;  %2991 = vmatpush3.bf16.msra.mxu1 %v3164_v31  ;;  %v3016_v10 = vround.rtne.f32 %v613_v46 }
 0x173   : > { %2993 = vmatmul.mubr.bf16.vlgmr.msra.gmra.mrb[32].mxu1 %v1407_v22 }
 0x174   : > { %2996 = vmatprep.mubr.bf16.mxu1 %v1416_v37 }
 0x17b   : > { %2997 = vmatmul.mubr.bf16.gmra.mrb[36].mxu1 %v1425_v48 }
 0x205   : > { %v2820_v51 = vpop.f32.mrb[0].mxu1 }
 0x206   : > { %v2821_v35 = vpop.f32.mrb[1].mxu1 }
 0x207   : > { %v2822_v52 = vadd.f32 %v2821_v35, %v2820_v51  ;;  %v2823_v38 = vpop.f32.mrb[2].mxu1  ;;  %v3017_v51 = vround.rtne.f32 %v614_v1 }
 0x208   : > { %v2824_v45 = vpop.f32.mrb[3].mxu1 }
 0x209   : > { %v2825_v29 = vadd.f32 %v2824_v45, %v2823_v38  ;;  %v3019_v38 = vround.rtne.f32 %v616_v43  ;;  %v630_v36 = vmax.f32 %v3017_v51, -32768.0 }
 0x20b   : > { %v2860_v6 = vpop.f32.mrb[16].mxu0 }
 0x20c   : > { %v2861_v15 = vpop.f32.mrb[17].mxu0 }
 0x20d   : > { %v2862_v5 = vadd.f32 %v2861_v15, %v2860_v6  ;;  %v2863_v63 = vpop.f32.mrb[18].mxu0  ;;  %v3021_v6 = vround.rtne.f32 %v618_v50 }
 0x20e   : > { %v2864_v14 = vpop.f32.mrb[19].mxu0  ;;  %v2826_v11 = vpop.f32.mrb[4].mxu1 }
 0x20f   : > { %v4015_v27 = vadd.f32 %v2862_v5, %v2822_v52  ;;  %v2865_v19 = vadd.f32 %v2864_v14, %v2863_v63  ;;  %v2827_v60 = vpop.f32.mrb[5].mxu1  ;;  %v629_v52 = vmax.f32 %v3016_v10, -32768.0 }
 0x210   : > { %v2828_v0 = vadd.f32 %v2827_v60, %v2826_v11  ;;  %v2829_v23 = vpop.f32.mrb[6].mxu1  ;;  %v631_v11 = vmax.f32 %v3018_v30, -32768.0 }
 0x211   : > { %v4017_v44 = vadd.f32 %v2865_v19, %v2825_v29  ;;  %v2830_v4 = vpop.f32.mrb[7].mxu1  ;;  %v3020_v29 = vround.rtne.f32 %v617_v26  ;;  %v3023_v19 = vround.rtne.f32 %v620_v54  ;;  %v637_v53 = vmin.f32 %v629_v52, 32767.0 }
 0x212   : > { %v2831_v7 = vadd.f32 %v2830_v4, %v2829_v23  ;;  %v632_v23 = vmax.f32 %v3019_v38, -32768.0 }
 0x213   : > { %v2866_v20 = vpop.f32.mrb[20].mxu0 }
 0x214   : > { %v2867_v12 = vpop.f32.mrb[21].mxu0 }
 0x215   : > { %v2868_v34 = vadd.f32 %v2867_v12, %v2866_v20  ;;  %v2869_v2 = vpop.f32.mrb[22].mxu0  ;;  %v633_v20 = vmax.f32 %v3020_v29, -32768.0  ;;  %v634_v12 = vmax.f32 %v3021_v6, -32768.0 }
 0x216   : > { %v2870_v47 = vpop.f32.mrb[23].mxu0  ;;  %v2832_v49 = vpop.f32.mrb[8].mxu1 }
 0x217   : > { %v4019_v59 = vadd.f32 %v2868_v34, %v2828_v0  ;;  %v2871_v39 = vadd.f32 %v2870_v47, %v2869_v2  ;;  %v2833_v62 = vpop.f32.mrb[9].mxu1  ;;  %v635_v47 = vmax.f32 %v3022_v41, -32768.0 }
 0x218   : > { %v2834_v40 = vadd.f32 %v2833_v62, %v2832_v49  ;;  %v2835_v33 = vpop.f32.mrb[10].mxu1  ;;  %v639_v62 = vmin.f32 %v631_v11, 32767.0 }
 0x219   : > { %v4021_v9 = vadd.f32 %v2871_v39, %v2831_v7  ;;  %v2836_v57 = vpop.f32.mrb[11].mxu1  ;;  %v638_v39 = vmin.f32 %v630_v36, 32767.0 }
 0x21a   : > { %v2837_v56 = vadd.f32 %v2836_v57, %v2835_v33 }
 0x21b   : > { %v2872_v24 = vpop.f32.mrb[24].mxu0 }
 0x21c   : > { %v2873_v25 = vpop.f32.mrb[25].mxu0 }
 0x21d   : > { %v2874_v31 = vadd.f32 %v2873_v25, %v2872_v24  ;;  %v2875_v8 = vpop.f32.mrb[26].mxu0  ;;  %v2677_v24 = vld [vmem:[%s4113_s4] ss:$0 sm:$0xff]  ;;  %v640_v25 = vmin.f32 %v632_v23, 32767.0 }
 0x21e   : > { %v2876_v58 = vpop.f32.mrb[27].mxu0  ;;  %v2838_v61 = vpop.f32.mrb[12].mxu1 }
 0x21f   : > { %v4024_v32 = vadd.f32 %v2874_v31, %v2834_v40  ;;  %v2877_v28 = vadd.f32 %v2876_v58, %v2875_v8  ;;  %v2839_v18 = vpop.f32.mrb[13].mxu1  ;;  %v636_v40 = vmax.f32 %v3023_v19, -32768.0  ;;  %v641_v8 = vmin.f32 %v633_v20, 32767.0 }
 0x220   : > { %v2840_v16 = vadd.f32 %v2839_v18, %v2838_v61  ;;  %v2841_v17 = vpop.f32.mrb[14].mxu1  ;;  %v642_v58 = vmin.f32 %v634_v12, 32767.0  ;;  %v648_v26 = vmul.f32 0.0009765625, %v640_v25 }
 0x221   : > { %v4029_v22 = vadd.f32 %v2877_v28, %v2837_v56  ;;  %v2842_v21 = vpop.f32.mrb[15].mxu1  ;;  %v645_v56 = vmul.f32 0.0009765625, %v637_v53  ;;  %v643_v28 = vmin.f32 %v635_v47, 32767.0  ;;  %v649_v42 = vmul.f32 0.0009765625, %v641_v8 }
 0x222   : > { %v2843_v37 = vadd.f32 %v2842_v21, %v2841_v17  ;;  %v647_v17 = vmul.f32 0.0009765625, %v639_v62 }
 0x223   : > { %v2878_v48 = vpop.f32.mrb[28].mxu0  ;;  %v660_v21 = vadd.f32 %v2677_v24, %v645_v56  ;;  %v651_v54 = vmul.f32 0.0009765625, %v643_v28 }
 0x224   : > { %v2879_v35 = vpop.f32.mrb[29].mxu0  ;;  %v662_v38 = vadd.f32 %v2677_v24, %v647_v17 }
 0x225   : > { %v2880_v45 = vadd.f32 %v2879_v35, %v2878_v48  ;;  %v2881_v3 = vpop.f32.mrb[30].mxu0  ;;  %v650_v48 = vmul.f32 0.0009765625, %v642_v58  ;;  %v668_v6 = vmul.f32 16.0, %v660_v21  ;;  %v666_v19 = vadd.f32 %v2677_v24, %v651_v54 }
 0x226   : > { %v2882_v15 = vpop.f32.mrb[31].mxu0  ;;  %v2900_v5 = vpop.f32.mrb[16].mxu1  ;;  %v670_v23 = vmul.f32 16.0, %v662_v38 }
 0x227   : > { %v4035_v63 = vadd.f32 %v2880_v45, %v2840_v16  ;;  %v2883_v55 = vadd.f32 %v2882_v15, %v2881_v3  ;;  %v2901_v14 = vpop.f32.mrb[17].mxu1  ;;  %v646_v16 = vmul.f32 0.0009765625, %v638_v39  ;;  %v663_v15 = vadd.f32 %v2677_v24, %v648_v26 }
 0x228   : > { %v2902_v60 = vadd.f32 %v2901_v14, %v2900_v5  ;;  %v2903_v0 = vpop.f32.mrb[18].mxu1  ;;  %v665_v14 = vadd.f32 %v2677_v24, %v650_v48  ;;  %v3026_v25 = vround.rtne.f32 %v670_v23 }
 0x229   : > { %v4037_v4 = vadd.f32 %v2883_v55, %v2843_v37  ;;  %v2904_v7 = vpop.f32.mrb[19].mxu1  ;;  %v661_v52 = vadd.f32 %v2677_v24, %v646_v16  ;;  %v664_v55 = vadd.f32 %v2677_v24, %v649_v42 }
 0x22a   : > { %v2211_v34 = vadd.f32 %v2902_v60, %v4015_v27  ;;  %v2905_v2 = vadd.f32 %v2904_v7, %v2903_v0  ;;  %v673_v39 = vmul.f32 16.0, %v665_v14  ;;  %v686_v21 = vmax.f32 %v3026_v25, -128.0 }
 0x22b   : > { %v2940_v49 = vpop.f32.mrb[32].mxu0  ;;  %v669_v53 = vmul.f32 16.0, %v661_v52 }
 0x22c   : > { %v2941_v33 = vpop.f32.mrb[33].mxu0  ;;  %v2214_v57 = vadd.f32 %v2905_v2, %v4017_v44  ;;  %v644_v44 = vmin.f32 %v636_v40, 32767.0 }
 0x22d   : > { %v2942_v46 = vadd.f32 %v2941_v33, %v2940_v49  ;;  %v2943_v31 = vpop.f32.mrb[34].mxu0  ;;  %v672_v49 = vmul.f32 16.0, %v664_v55  ;;  %v674_v33 = vmul.f32 16.0, %v666_v19  ;;  %v3025_v56 = vround.rtne.f32 %v669_v53 }
 0x22e   : > { %v2944_v27 = vpop.f32.mrb[35].mxu0  ;;  %v2906_v61 = vpop.f32.mrb[20].mxu1  ;;  %v652_v45 = vmul.f32 0.0009765625, %v644_v44 }
 0x22f   : > { %v2945_v18 = vadd.f32 %v2944_v27, %v2943_v31  ;;  %v2907_v1 = vpop.f32.mrb[21].mxu1  ;;  %v4044_v13 = vadd.f32 %v2942_v46, %v2211_v34  ;;  %v3024_v34 = vround.rtne.f32 %v668_v6  ;;  %v3028_v28 = vround.rtne.f32 %v672_v49 }
 0x230   : > { %v2908_v10 = vadd.f32 %v2907_v1, %v2906_v61  ;;  %v2909_v43 = vpop.f32.mrb[22].mxu1  ;;  %v667_v7 = vadd.f32 %v2677_v24, %v652_v45  ;;  %v3030_v17 = vround.rtne.f32 %v674_v33  ;;  %v694_v6 = vmin.f32 %v686_v21, 127.0 }
 0x231   : > { %v2910_v50 = vpop.f32.mrb[23].mxu1  ;;  %v4046_v37 = vadd.f32 %v2945_v18, %v2214_v57  ;;  %v684_v8 = vmax.f32 %v3024_v34, -128.0  ;;  %v3029_v18 = vround.rtne.f32 %v673_v39  ;;  %v688_v54 = vmax.f32 %v3028_v28, -128.0  ;;  %v2760_v34 = vld [vmem:[%s4116_s7] ss:$0 sm:$0xff] }
 0x232   : > { %v2219_v51 = vadd.f32 %v2908_v10, %v4019_v59  ;;  %v2911_v30 = vadd.f32 %v2910_v50, %v2909_v43  ;;  %v675_v46 = vmul.f32 16.0, %v667_v7  ;;  %v685_v43 = vmax.f32 %v3025_v56, -128.0 }
 0x233   : > { %v2946_v35 = vpop.f32.mrb[36].mxu0  ;;  %v692_v48 = vmin.f32 %v684_v8, 127.0  ;;  %v690_v45 = vmax.f32 %v3030_v17, -128.0  ;;  %v696_v19 = vmin.f32 %v688_v54, 127.0  ;;  %v2758_v54 = vld [vmem:[%s4114_s5] ss:$0 sm:$0xff] }
 0x234   : > { %v2947_v3 = vpop.f32.mrb[37].mxu0  ;;  %v2222_v29 = vadd.f32 %v2911_v30, %v4021_v9  ;;  %v671_v9 = vmul.f32 16.0, %v663_v15  ;;  %v3031_v26 = vround.rtne.f32 %v675_v46 }
 0x235   : > { %v2948_v5 = vadd.f32 %v2947_v3, %v2946_v35  ;;  %v2949_v41 = vpop.f32.mrb[38].mxu0  ;;  %v689_v35 = vmax.f32 %v3029_v18, -128.0  ;;  %v698_v23 = vmin.f32 %v690_v45, 127.0  ;;  %v704_v25 = vmul.f32 0.0625, %v696_v19 }
 0x236   : > { %v2950_v36 = vpop.f32.mrb[39].mxu0  ;;  %v2912_v11 = vpop.f32.mrb[24].mxu1  ;;  %v3027_v58 = vround.rtne.f32 %v671_v9  ;;  %v691_v15 = vmax.f32 %v3031_v26, -128.0 }
 0x237   : > { %v2951_v60 = vadd.f32 %v2950_v36, %v2949_v41  ;;  %v2913_v59 = vpop.f32.mrb[25].mxu1  ;;  %v4050_v0 = vadd.f32 %v2948_v5, %v2219_v51  ;;  %v706_v8 = vmul.f32 0.0625, %v698_v23 }
 0x238   : > { %v2914_v20 = vadd.f32 %v2913_v59, %v2912_v11  ;;  %v2915_v12 = vpop.f32.mrb[26].mxu1  ;;  %v700_v11 = vmul.f32 0.0625, %v692_v48 }
 0x239   : > { %v2916_v2 = vpop.f32.mrb[27].mxu1  ;;  %v4052_v47 = vadd.f32 %v2951_v60, %v2222_v29  ;;  %v693_v29 = vmin.f32 %v685_v43, 127.0  ;;  %v697_v60 = vmin.f32 %v689_v35, 127.0  ;;  %v4081_v26 = vmul.f32 %v2760_v34, %v706_v8 }
 0x23a   : > { %v2227_v62 = vadd.f32 %v2914_v20, %v4024_v32  ;;  %v2917_v40 = vadd.f32 %v2916_v2, %v2915_v12  ;;  %v699_v2 = vmin.f32 %v691_v15, 127.0 }
 0x23b   : > { %v2952_v57 = vpop.f32.mrb[40].mxu0  ;;  %v701_v9 = vmul.f32 0.0625, %v693_v29 }
 0x23c   : > { %v2953_v31 = vpop.f32.mrb[41].mxu0  ;;  %v2230_v24 = vadd.f32 %v2917_v40, %v4029_v22  ;;  %v687_v22 = vmax.f32 %v3027_v58, -128.0 }
 0x23d   : > { %v2954_v27 = vadd.f32 %v2953_v31, %v2952_v57  ;;  %v2955_v61 = vpop.f32.mrb[42].mxu0 }
 0x23e   : > { %v2956_v1 = vpop.f32.mrb[43].mxu0  ;;  %v2918_v16 = vpop.f32.mrb[28].mxu1  ;;  %v695_v55 = vmin.f32 %v687_v22, 127.0 }
 0x23f   : > { %v2957_v44 = vadd.f32 %v2956_v1, %v2955_v61  ;;  %v2919_v32 = vpop.f32.mrb[29].mxu1  ;;  %v4056_v10 = vadd.f32 %v2954_v27, %v2227_v62  ;;  %v4071_v61 = vmul.f32 %v2760_v34, %v701_v9 }
 0x240   : > { %v2920_v50 = vadd.f32 %v2919_v32, %v2918_v16  ;;  %v2921_v42 = vpop.f32.mrb[30].mxu1  ;;  %v703_v62 = vmul.f32 0.0625, %v695_v55 }
 0x241   : > { %v2922_v51 = vpop.f32.mrb[31].mxu1  ;;  %v4058_v30 = vadd.f32 %v2957_v44, %v2230_v24  ;;  %v4069_v24 = vmul.f32 %v2760_v34, %v700_v11  ;;  %v4077_v44 = vmul.f32 %v2760_v34, %v704_v25 }
 0x242   : > { %v2235_v52 = vadd.f32 %v2920_v50, %v4035_v63  ;;  %v2923_v38 = vadd.f32 %v2922_v51, %v2921_v42 }
 0x243   : > { %v2958_v3 = vpop.f32.mrb[44].mxu0 }
 0x244   : > { %v2959_v5 = vpop.f32.mrb[45].mxu0  ;;  %v2238_v41 = vadd.f32 %v2923_v38, %v4037_v4  ;;  %v702_v4 = vmul.f32 0.0625, %v694_v6 }
 0x245   : > { %v2960_v14 = vadd.f32 %v2959_v5, %v2958_v3  ;;  %v2961_v36 = vpop.f32.mrb[46].mxu0 }
 0x246   : > { %v2962_v59 = vpop.f32.mrb[47].mxu0  ;;  %v2994_v53 = vpop.f32.mrb[32].mxu1  ;;  %v4073_v1 = vmul.f32 %v2760_v34, %v702_v4 }
 0x247   : > { %v2963_v7 = vadd.f32 %v2962_v59, %v2961_v36  ;;  %v2349_v63 = vadd.f32 %v2994_v53, %v4050_v0  ;;  %v2340_v20 = vpop.f32.mrb[33].mxu1  ;;  %v2300_v12 = vadd.f32 %v2960_v14, %v2235_v52  ;;  %v705_v0 = vmul.f32 0.0625, %v697_v60 }
 0x248   : > { %v2341_v49 = vadd.f32 %v2340_v20, %v4044_v13  ;;  %v2995_v39 = vpop.f32.mrb[34].mxu1  ;;  %v707_v13 = vmul.f32 0.0625, %v699_v2 }
 0x249   : > { %v2373_v40 = vmul.f32 1024.0, %v2349_v63  ;;  %v2352_v33 = vadd.f32 %v2995_v39, %v4052_v47  ;;  %v2343_v57 = vpop.f32.mrb[35].mxu1  ;;  %v2303_v56 = vadd.f32 %v2963_v7, %v2238_v41  ;;  %v4075_v47 = vmul.f32 %v2760_v34, %v703_v62 }
 0x24a   : > { %v2371_v46 = vmul.f32 1024.0, %v2341_v49  ;;  %v2344_v31 = vadd.f32 %v2343_v57, %v4046_v37  ;;  %v4079_v32 = vmul.f32 %v2760_v34, %v705_v0  ;;  %v4083_v51 = vmul.f32 %v2760_v34, %v707_v13 }
 0x24b   : > { %v3034_v58 = vround.rtne.f32 %v2373_v40  ;;  %v2374_v27 = vmul.f32 1024.0, %v2352_v33 }
 0x24c   : > { %v3032_v28 = vround.rtne.f32 %v2371_v46  ;;  %v2372_v18 = vmul.f32 1024.0, %v2344_v31 }
 0x24d   : > { %v2389_v16 = vmax.f32 %v3034_v58, -32768.0  ;;  %v3035_v17 = vround.rtne.f32 %v2374_v27 }
 0x24e   : > { %v2387_v37 = vmax.f32 %v3032_v28, -32768.0  ;;  %v3033_v43 = vround.rtne.f32 %v2372_v18  ;;  %v2998_v21 = vpop.f32.mrb[36].mxu1 }
 0x24f   : > { %v2397_v50 = vmin.f32 %v2389_v16, 32767.0  ;;  %v2390_v42 = vmax.f32 %v3035_v17, -32768.0  ;;  %v2365_v48 = vadd.f32 %v2998_v21, %v2300_v12  ;;  %v2356_v22 = vpop.f32.mrb[37].mxu1 }
 0x250   : > { %v2395_v35 = vmin.f32 %v2387_v37, 32767.0  ;;  %v2388_v52 = vmax.f32 %v3033_v43, -32768.0  ;;  %v2357_v38 = vadd.f32 %v2356_v22, %v4056_v10  ;;  %v2999_v45 = vpop.f32.mrb[38].mxu1  ;;  %v2759_v43 = vld [vmem:[%s4115_s6] ss:$0 sm:$0xff] }
 0x251   : > { %v2405_v3 = vmul.f32 0.0009765625, %v2397_v50  ;;  %v2398_v29 = vmin.f32 %v2390_v42, 32767.0  ;;  %v2377_v6 = vmul.f32 1024.0, %v2365_v48  ;;  %v2368_v15 = vadd.f32 %v2999_v45, %v2303_v56  ;;  %v2359_v5 = vpop.f32.mrb[39].mxu1 }
 0x252   : > { %v2403_v41 = vmul.f32 0.0009765625, %v2395_v35  ;;  %v2396_v55 = vmin.f32 %v2388_v52, 32767.0  ;;  %v2375_v14 = vmul.f32 1024.0, %v2357_v38  ;;  %v2360_v36 = vadd.f32 %v2359_v5, %v4058_v30 }
 0x253   : > { %v2420_v11 = vadd.f32 %v2758_v54, %v2405_v3  ;;  %v2406_v19 = vmul.f32 0.0009765625, %v2398_v29  ;;  %v3038_v60 = vround.rtne.f32 %v2377_v6  ;;  %v2378_v59 = vmul.f32 1024.0, %v2368_v15 }
 0x254   : > { %v2418_v53 = vadd.f32 %v2758_v54, %v2403_v41  ;;  %v2404_v23 = vmul.f32 0.0009765625, %v2396_v55  ;;  %v3036_v7 = vround.rtne.f32 %v2375_v14  ;;  %v2376_v63 = vmul.f32 1024.0, %v2360_v36 }
 0x255   : > { %v2428_v10 = vmul.f32 16.0, %v2420_v11  ;;  %v2421_v20 = vadd.f32 %v2758_v54, %v2406_v19  ;;  %v2393_v12 = vmax.f32 %v3038_v60, -32768.0  ;;  %v3039_v34 = vround.rtne.f32 %v2378_v59 }
 0x256   : > { %v2426_v9 = vmul.f32 16.0, %v2418_v53  ;;  %v2419_v4 = vadd.f32 %v2758_v54, %v2404_v23  ;;  %v2391_v2 = vmax.f32 %v3036_v7, -32768.0  ;;  %v3037_v49 = vround.rtne.f32 %v2376_v63 }
 0x257   : > { %v3042_v39 = vround.rtne.f32 %v2428_v10  ;;  %v2429_v62 = vmul.f32 16.0, %v2421_v20  ;;  %v2401_v40 = vmin.f32 %v2393_v12, 32767.0  ;;  %v2394_v30 = vmax.f32 %v3039_v34, -32768.0 }
 0x258   : > { %v3040_v33 = vround.rtne.f32 %v2426_v9  ;;  %v2427_v57 = vmul.f32 16.0, %v2419_v4  ;;  %v2399_v56 = vmin.f32 %v2391_v2, 32767.0  ;;  %v2392_v25 = vmax.f32 %v3037_v49, -32768.0 }
 0x259   : > { %v2444_v0 = vmax.f32 %v3042_v39, -128.0  ;;  %v3043_v46 = vround.rtne.f32 %v2429_v62  ;;  %v2409_v31 = vmul.f32 0.0009765625, %v2401_v40  ;;  %v2402_v8 = vmin.f32 %v2394_v30, 32767.0 }
 0x25a   : > { %v2442_v58 = vmax.f32 %v3040_v33, -128.0  ;;  %v3041_v27 = vround.rtne.f32 %v2427_v57  ;;  %v2407_v13 = vmul.f32 0.0009765625, %v2399_v56  ;;  %v2400_v28 = vmin.f32 %v2392_v25, 32767.0 }
 0x25b   : > { %v2452_v18 = vmin.f32 %v2444_v0, 127.0  ;;  %v2445_v16 = vmax.f32 %v3043_v46, -128.0  ;;  %v2424_v17 = vadd.f32 %v2758_v54, %v2409_v31  ;;  %v2410_v37 = vmul.f32 0.0009765625, %v2402_v8 }
 0x25c   : > { %v2450_v21 = vmin.f32 %v2442_v58, 127.0  ;;  %v2443_v50 = vmax.f32 %v3041_v27, -128.0  ;;  %v2422_v42 = vadd.f32 %v2758_v54, %v2407_v13  ;;  %v2408_v48 = vmul.f32 0.0009765625, %v2400_v28 }
 0x25d   : > { %v2460_v22 = vmul.f32 0.0625, %v2452_v18  ;;  %v2453_v35 = vmin.f32 %v2445_v16, 127.0  ;;  %v2432_v52 = vmul.f32 16.0, %v2424_v17  ;;  %v2425_v38 = vadd.f32 %v2758_v54, %v2410_v37 }
 0x25e   : > { %v2458_v45 = vmul.f32 0.0625, %v2450_v21  ;;  %v2451_v3 = vmin.f32 %v2443_v50, 127.0  ;;  %v2430_v29 = vmul.f32 16.0, %v2422_v42  ;;  %v2423_v6 = vadd.f32 %v2758_v54, %v2408_v48 }
 0x25f   : > { %v2475_v15 = vmul.f32 %v2759_v43, %v2460_v22  ;;  %v2461_v5 = vmul.f32 0.0625, %v2453_v35  ;;  %v3046_v41 = vround.rtne.f32 %v2432_v52  ;;  %v2433_v55 = vmul.f32 16.0, %v2425_v38 }
 0x260   : > { %v2473_v14 = vmul.f32 %v2759_v43, %v2458_v45  ;;  %v2459_v36 = vmul.f32 0.0625, %v2451_v3  ;;  %v3044_v11 = vround.rtne.f32 %v2430_v29  ;;  %v2431_v19 = vmul.f32 16.0, %v2423_v6 }
 0x261   : > { %v2498_v60 = vadd.f32 %v4073_v1, %v2475_v15  ;;  %v2476_v59 = vmul.f32 %v2759_v43, %v2461_v5  ;;  %v2448_v53 = vmax.f32 %v3046_v41, -128.0  ;;  %v3047_v23 = vround.rtne.f32 %v2433_v55 }
 0x262   : > { %v2496_v7 = vadd.f32 %v4069_v24, %v2473_v14  ;;  %v2474_v63 = vmul.f32 %v2759_v43, %v2459_v36  ;;  %v2446_v10 = vmax.f32 %v3044_v11, -128.0  ;;  %v3045_v20 = vround.rtne.f32 %v2431_v19 }
 0x263   : > { %v2506_v12 = vmul.f32 16.0, %v2498_v60  ;;  %v2499_v54 = vadd.f32 %v4075_v47, %v2476_v59  ;;  %v2456_v34 = vmin.f32 %v2448_v53, 127.0  ;;  %v2449_v9 = vmax.f32 %v3047_v23, -128.0 }
 0x264   : > { %v2504_v4 = vmul.f32 16.0, %v2496_v7  ;;  %v2497_v2 = vadd.f32 %v4071_v61, %v2474_v63  ;;  %v2454_v49 = vmin.f32 %v2446_v10, 127.0  ;;  %v2447_v39 = vmax.f32 %v3045_v20, -128.0 }
 0x265   : > { %v3050_v62 = vround.rtne.f32 %v2506_v12  ;;  %v2507_v1 = vmul.f32 16.0, %v2499_v54  ;;  %v2464_v40 = vmul.f32 0.0625, %v2456_v34  ;;  %v2457_v30 = vmin.f32 %v2449_v9, 127.0 }
 0x266   : > { %v3048_v33 = vround.rtne.f32 %v2504_v4  ;;  %v2505_v57 = vmul.f32 16.0, %v2497_v2  ;;  %v2462_v24 = vmul.f32 0.0625, %v2454_v49  ;;  %v2455_v56 = vmin.f32 %v2447_v39, 127.0 }
 0x267   : > { %v2522_v25 = vmax.f32 %v3050_v62, -128.0  ;;  %v3051_v0 = vround.rtne.f32 %v2507_v1  ;;  %v2479_v46 = vmul.f32 %v2759_v43, %v2464_v40  ;;  %v2465_v31 = vmul.f32 0.0625, %v2457_v30 }
 0x268   : > { %v2520_v47 = vmax.f32 %v3048_v33, -128.0  ;;  %v3049_v8 = vround.rtne.f32 %v2505_v57  ;;  %v2477_v58 = vmul.f32 %v2759_v43, %v2462_v24  ;;  %v2463_v27 = vmul.f32 0.0625, %v2455_v56 }
 0x269   : > { %v2530_v13 = vmin.f32 %v2522_v25, 127.0  ;;  %v2523_v61 = vmax.f32 %v3051_v0, -128.0  ;;  %v2502_v28 = vadd.f32 %v4081_v26, %v2479_v46  ;;  %v2480_v18 = vmul.f32 %v2759_v43, %v2465_v31 }
 0x26a   : > { %v2528_v16 = vmin.f32 %v2520_v47, 127.0  ;;  %v2521_v17 = vmax.f32 %v3049_v8, -128.0  ;;  %v2500_v37 = vadd.f32 %v4077_v44, %v2477_v58  ;;  %v2478_v21 = vmul.f32 %v2759_v43, %v2463_v27 }
 0x26b   : > { %v2538_v50 = vmul.f32 0.0625, %v2530_v13  ;;  %v2531_v42 = vmin.f32 %v2523_v61, 127.0  ;;  %v2510_v48 = vmul.f32 16.0, %v2502_v28  ;;  %v2503_v22 = vadd.f32 %v4083_v51, %v2480_v18 }
 0x26c   : > { %v2536_v35 = vmul.f32 0.0625, %v2528_v16  ;;  %v2529_v52 = vmin.f32 %v2521_v17, 127.0  ;;  %v2508_v38 = vmul.f32 16.0, %v2500_v37  ;;  %v2501_v45 = vadd.f32 %v4079_v32, %v2478_v21 }
 0x26d   : > { %v2539_v3 = vmul.f32 0.0625, %v2531_v42  ;;  %v3054_v29 = vround.rtne.f32 %v2510_v48  ;;  %v2511_v26 = vmul.f32 16.0, %v2503_v22  ;;  %v2546_v41 = vmax.f32 %v2538_v50, 0.0 }
 0x26e   : > { %v2537_v6 = vmul.f32 0.0625, %v2529_v52  ;;  %v3052_v15 = vround.rtne.f32 %v2508_v38  ;;  %v2509_v5 = vmul.f32 16.0, %v2501_v45  ;;  %v2544_v14 = vmax.f32 %v2536_v35, 0.0 }
 0x26f   : > { %v2547_v44 = vmax.f32 %v2539_v3, 0.0  ;;  %v2526_v43 = vmax.f32 %v3054_v29, -128.0  ;;  %v3055_v55 = vround.rtne.f32 %v2511_v26 }
 0x270   : > { %v2545_v51 = vmax.f32 %v2537_v6, 0.0  ;;  %v2524_v36 = vmax.f32 %v3052_v15, -128.0  ;;  %v3053_v11 = vround.rtne.f32 %v2509_v5 }
 0x271   : > { %v2789_v32 = vpack.c.bf16 %v2547_v44, %v2546_v41  ;;  %v2534_v19 = vmin.f32 %v2526_v43, 127.0  ;;  %v2527_v60 = vmax.f32 %v3055_v55, -128.0 }
 0x272   : > { %v2784_v59 = vpack.c.bf16 %v2545_v51, %v2544_v14  ;;  %v2532_v53 = vmin.f32 %v2524_v36, 127.0  ;;  %v2525_v23 = vmax.f32 %v3053_v11, -128.0 }
 0x273   : > { %2801 = vst [vmem:[%s305_s9 + $0x8] sm:$0xff] %v2789_v32   ;;  %v2542_v7 = vmul.f32 0.0625, %v2534_v19  ;;  %v2535_v63 = vmin.f32 %v2527_v60, 127.0 }
 0x274   : > { %2785 = vst [vmem:[%s305_s9] sm:$0xff] %v2784_v59   ;;  %v2540_v10 = vmul.f32 0.0625, %v2532_v53  ;;  %v2533_v20 = vmin.f32 %v2525_v23, 127.0 }
 0x275   : > { %v2543_v12 = vmul.f32 0.0625, %v2535_v63  ;;  %v2550_v34 = vmax.f32 %v2542_v7, 0.0 }
 0x276   : > { %v2541_v54 = vmul.f32 0.0625, %v2533_v20  ;;  %v2548_v4 = vmax.f32 %v2540_v10, 0.0 }
 0x277   : > { %v2551_v9 = vmax.f32 %v2543_v12, 0.0 }
 0x278   : > { %v2549_v2 = vmax.f32 %v2541_v54, 0.0 }
 0x279   : > { %v2799_v49 = vpack.c.bf16 %v2551_v9, %v2550_v34 }
 0x27a   : > { %v2794_v39 = vpack.c.bf16 %v2549_v2, %v2548_v4 }
 0x27b   : > { %2803 = vst [vmem:[%s305_s9 + $0x18] sm:$0xff] %v2799_v49  }
 0x27c   : > { %2802 = vst [vmem:[%s305_s9 + $0x10] sm:$0xff] %v2794_v39  }
 0x27d PF: > { %s18_s27 = sadd.s32 1, %s3171_s27  }
 0x27e   : > { %p15_p4 = scmp.ge.s32.totalorder %s18_s27, 4  }
 0x280   :  { %17 = sbr.rel (!%p15_p4) target bundleno = 1 (0x1), region = 82 }

</bundles_post_ra>
